<compile_context>
chip_gen: v5e
topology: v5e:2x2
jax: 0.10.0
libtpu: 0.0.40
codegen_flags: <defaults>
</compile_context>

<pallas_src>
import jax
import jax.numpy as jnp
from jax.experimental import pallas as pl
from jax.experimental.pallas import tpu as pltpu


def _round_up(x, m):
    return (x + m - 1) // m * m


_COMPILER_PARAMS = pltpu.CompilerParams(
    dimension_semantics=("parallel",),
    vmem_limit_bytes=32 * 1024 * 1024,
)


# ----------------------------- Pallas kernels ------------------------------ #

def _conv_relu_pool_kernel(x_ref, w_ref, b_ref, o_ref):
    # x_ref: (4, TM, Kpad) bf16 -- 4 = the members of each 2x2 pool window
    # w_ref: (Kpad, Npad) bf16, b_ref: (1, Npad) f32, o_ref: (TM, Npad)
    m = jnp.dot(x_ref[0], w_ref[...], preferred_element_type=jnp.float32)
    for e in range(1, 4):
        m = jnp.maximum(
            m, jnp.dot(x_ref[e], w_ref[...], preferred_element_type=jnp.float32))
    # max_e relu(z_e + b) == relu(max_e z_e + b): bias/relu once, after the pool max.
    o_ref[...] = jnp.maximum(m + b_ref[...], 0.0).astype(o_ref.dtype)


def _fc_head_kernel(x_ref, w1_ref, b1_ref, w2_ref, b2_ref, w3_ref, b3_ref, o_ref):
    # fc1 -> relu -> fc2 -> relu -> fc3; intermediates stay in VMEM / vregs.
    h = jnp.dot(x_ref[...], w1_ref[...], preferred_element_type=jnp.float32)
    h = jnp.maximum(h + b1_ref[...], 0.0)
    h = jnp.dot(h.astype(jnp.bfloat16), w2_ref[...], preferred_element_type=jnp.float32)
    h = jnp.maximum(h + b2_ref[...], 0.0)
    h = jnp.dot(h.astype(jnp.bfloat16), w3_ref[...], preferred_element_type=jnp.float32)
    o_ref[...] = (h + b3_ref[...]).astype(o_ref.dtype)


# ------------------------------ wrappers ----------------------------------- #

def conv_relu_pool_pallas(cols4, w_pad, b_pad, *, tm=256, out_dtype=jnp.bfloat16):
    """cols4: (4, Mp, K) pool-grouped im2col patches. Returns (Mp, Npad)."""
    _, Mp, K = cols4.shape
    Kpad, Npad = w_pad.shape
    TM = min(tm, _round_up(Mp, 8))
    Mp_pad = _round_up(Mp, TM)
    cols4 = jnp.pad(cols4.astype(jnp.bfloat16),
                    ((0, 0), (0, Mp_pad - Mp), (0, Kpad - K)))
    out = pl.pallas_call(
        _conv_relu_pool_kernel,
        out_shape=jax.ShapeDtypeStruct((Mp_pad, Npad), out_dtype),
        grid=(Mp_pad // TM,),
        in_specs=[
            pl.BlockSpec((4, TM, Kpad), lambda i: (0, i, 0)),
            pl.BlockSpec((Kpad, Npad), lambda i: (0, 0)),
            pl.BlockSpec((1, Npad), lambda i: (0, 0)),
        ],
        out_specs=pl.BlockSpec((TM, Npad), lambda i: (i, 0)),
        compiler_params=_COMPILER_PARAMS,
    )(cols4, w_pad, b_pad)
    return out[:Mp]


def fc_head_pallas(x, w1, b1, w2, b2, w3, b3, *, tm=256):
    """Fused fc1(relu) -> fc2(relu) -> fc3 on padded, lane-aligned operands."""
    M, K = x.shape
    K1, _ = w1.shape
    N3 = w3.shape[1]
    TM = min(tm, _round_up(M, 8))
    M_pad = _round_up(M, TM)
    x = jnp.pad(x.astype(jnp.bfloat16), ((0, M_pad - M), (0, K1 - K)))
    out = pl.pallas_call(
        _fc_head_kernel,
        out_shape=jax.ShapeDtypeStruct((M_pad, N3), jnp.float32),
        grid=(M_pad // TM,),
        in_specs=[
            pl.BlockSpec((TM, K1), lambda i: (i, 0)),
            pl.BlockSpec(w1.shape, lambda i: (0, 0)),
            pl.BlockSpec(b1.shape, lambda i: (0, 0)),
            pl.BlockSpec(w2.shape, lambda i: (0, 0)),
            pl.BlockSpec(b2.shape, lambda i: (0, 0)),
            pl.BlockSpec(w3.shape, lambda i: (0, 0)),
            pl.BlockSpec(b3.shape, lambda i: (0, 0)),
        ],
        out_specs=pl.BlockSpec((TM, N3), lambda i: (i, 0)),
        compiler_params=_COMPILER_PARAMS,
    )(x, w1, b1, w2, b2, w3, b3)
    return out[:M]


def _im2col_pool_grouped(x_nhwc, k):
    """k x k valid patches (stride 1), grouped by 2x2 pool window.

    Returns cols4 of shape (4, B*Hp*Wp, k*k*C) where cols4[2*dy+dx, (b,hp,wp)] is the
    patch at conv-output position (2*hp+dy, 2*wp+dx); column order (kh, kw, c_in)
    matches the packed weight matrices.
    """
    B, H, W, C = x_nhwc.shape
    Ho, Wo = H - k + 1, W - k + 1
    Hp, Wp = Ho // 2, Wo // 2
    slices = [x_nhwc[:, di:di + Ho, dj:dj + Wo, :]
              for di in range(k) for dj in range(k)]
    p = jnp.stack(slices, axis=3).reshape(B, Ho, Wo, k * k * C)
    p = p[:, :2 * Hp, :2 * Wp, :].reshape(B, Hp, 2, Wp, 2, k * k * C)
    p = jnp.transpose(p, (2, 4, 0, 1, 3, 5))          # (dy, dx, B, Hp, Wp, K)
    return p.reshape(4, B * Hp * Wp, k * k * C), (B, Hp, Wp)


# ------------------------------ parameters --------------------------------- #

def init_params(key):
    ks = jax.random.split(key, 10)

    def u(k, shape, fan_in):
        bound = 1.0 / jnp.sqrt(fan_in)
        return jax.random.uniform(k, shape, jnp.float32, -bound, bound)

    return {
        "conv1_w": u(ks[0], (6, 3, 5, 5), 3 * 5 * 5),
        "conv1_b": u(ks[1], (6,), 3 * 5 * 5),
        "conv2_w": u(ks[2], (16, 6, 5, 5), 6 * 5 * 5),
        "conv2_b": u(ks[3], (16,), 6 * 5 * 5),
        "fc1_w": u(ks[4], (120, 400), 400),   # PyTorch Linear: (out, in)
        "fc1_b": u(ks[5], (120,), 400),
        "fc2_w": u(ks[6], (84, 120), 120),
        "fc2_b": u(ks[7], (84,), 120),
        "fc3_w": u(ks[8], (10, 84), 84),
        "fc3_b": u(ks[9], (10,), 84),
    }


def pack_params(params):
    """One-time packing: transpose to (K, N), zero-pad to lane-aligned multiples of
    128, cast matmul operands to bf16 and biases to padded f32 rows."""
    def pad_w(w, kp, np_):
        K, N = w.shape
        return jnp.pad(w, ((0, kp - K), (0, np_ - N))).astype(jnp.bfloat16)

    def pad_b(b, np_):
        return jnp.pad(b, (0, np_ - b.shape[0])).astype(jnp.float32).reshape(1, np_)

    # conv weights: (C_out, C_in, KH, KW) -> (KH*KW*C_in, C_out), matching im2col
    # column order (kh, kw, c_in).
    c1 = jnp.transpose(params["conv1_w"], (2, 3, 1, 0)).reshape(5 * 5 * 3, 6)
    c2 = jnp.transpose(params["conv2_w"], (2, 3, 1, 0)).reshape(5 * 5 * 6, 16)
    return {
        "conv1_w": pad_w(c1, 128, 128), "conv1_b": pad_b(params["conv1_b"], 128),
        "conv2_w": pad_w(c2, 256, 128), "conv2_b": pad_b(params["conv2_b"], 128),
        "fc1_w": pad_w(params["fc1_w"].T, 512, 128), "fc1_b": pad_b(params["fc1_b"], 128),
        "fc2_w": pad_w(params["fc2_w"].T, 128, 128), "fc2_b": pad_b(params["fc2_b"], 128),
        "fc3_w": pad_w(params["fc3_w"].T, 128, 128), "fc3_b": pad_b(params["fc3_b"], 128),
    }


# ------------------------------ the network -------------------------------- #

@jax.jit
def net_forward(packed, x_nchw):
    B = x_nchw.shape[0]
    x = jnp.transpose(x_nchw, (0, 2, 3, 1)).astype(jnp.bfloat16)    # NCHW -> NHWC

    # conv1 + relu + 2x2 pool (fused kernel)
    cols4, (_, Hp, Wp) = _im2col_pool_grouped(x, 5)                 # (4, B*196, 75)
    y = conv_relu_pool_pallas(cols4, packed["conv1_w"], packed["conv1_b"])
    x = y[:, :6].reshape(B, Hp, Wp, 6)                              # (B, 14, 14, 6)

    # conv2 + relu + 2x2 pool (fused kernel)
    cols4, (_, Hp, Wp) = _im2col_pool_grouped(x, 5)                 # (4, B*25, 150)
    y = conv_relu_pool_pallas(cols4, packed["conv2_w"], packed["conv2_b"])
    x = y[:, :16].reshape(B, Hp, Wp, 16)                            # (B, 5, 5, 16)

    # PyTorch flattens in NCHW (C, H, W) order before fc1.
    x = jnp.transpose(x, (0, 3, 1, 2)).reshape(B, 16 * 5 * 5)       # (B, 400)

    # fused fc1 -> fc2 -> fc3 (single kernel)
    out = fc_head_pallas(x, packed["fc1_w"], packed["fc1_b"],
                         packed["fc2_w"], packed["fc2_b"],
                         packed["fc3_w"], packed["fc3_b"])          # (B, 128)
    return out[:, :10]


if __name__ == "__main__":
    key = jax.random.PRNGKey(0)
    k_param, k_x = jax.random.split(key)
    params = init_params(k_param)
    packed = pack_params(params)
    # Input must be 3x32x32 so the flatten to 16*5*5 matches the module.
    x = jax.random.normal(k_x, (2, 3, 32, 32), dtype=jnp.float32)

    out = net_forward(packed, x)
    out = jax.block_until_ready(out)
    assert out.shape == (2, 10) and out.dtype == jnp.float32
    print("KERNEL_OK")
</pallas_src>

<mosaic_0001>
module attributes {stable_mosaic.version = 11 : i64} {
  func.func @_conv_relu_pool_kernel(%arg0: i32, %arg1: memref<4x256x128xbf16, #tpu.memory_space<vmem>>, %arg2: memref<128x128xbf16, #tpu.memory_space<vmem>>, %arg3: memref<1x128xf32, #tpu.memory_space<vmem>>, %arg4: memref<256x128xbf16, #tpu.memory_space<vmem>>) attributes {dimension_semantics = [#tpu.dimension_semantics<parallel>], iteration_bounds = array<i64: 2>, scalar_prefetch = 0 : i64, scratch_operands = 0 : i64, tpu.core_type = #tpu.core_type<tc>, window_params = [{transform_indices = @transform_0, window_bounds = array<i64: 4, 256, 128>}, {pipeline_mode = #tpu.pipeline_mode<synchronous>, transform_indices = @transform_1, window_bounds = array<i64: 128, 128>}, {pipeline_mode = #tpu.pipeline_mode<synchronous>, transform_indices = @transform_2, window_bounds = array<i64: 1, 128>}, {transform_indices = @transform_3, window_bounds = array<i64: 256, 128>}]} {
    %c0 = arith.constant 0 : index
    %c0_0 = arith.constant 0 : index
    %c0_1 = arith.constant 0 : index
    %0 = vector.load %arg1[%c0, %c0_0, %c0_1] : memref<4x256x128xbf16, #tpu.memory_space<vmem>>, vector<1x256x128xbf16>
    %1 = vector.shape_cast %0 : vector<1x256x128xbf16> to vector<256x128xbf16>
    %c0_2 = arith.constant 0 : index
    %c0_3 = arith.constant 0 : index
    %2 = vector.load %arg2[%c0_2, %c0_3] : memref<128x128xbf16, #tpu.memory_space<vmem>>, vector<128x128xbf16>
    %cst = arith.constant dense<0.000000e+00> : vector<256x128xf32>
    %3 = tpu.matmul %1, %2, %cst {dimension_numbers = #tpu.dot_dimension_numbers<[1], [0], [0], [1], [0, 0, 1, 1], [], []>} : vector<256x128xbf16>, vector<128x128xbf16>, vector<256x128xf32> -> vector<256x128xf32>
    %c1 = arith.constant 1 : index
    %c0_4 = arith.constant 0 : index
    %c0_5 = arith.constant 0 : index
    %4 = vector.load %arg1[%c1, %c0_4, %c0_5] : memref<4x256x128xbf16, #tpu.memory_space<vmem>>, vector<1x256x128xbf16>
    %5 = vector.shape_cast %4 : vector<1x256x128xbf16> to vector<256x128xbf16>
    %c0_6 = arith.constant 0 : index
    %c0_7 = arith.constant 0 : index
    %6 = vector.load %arg2[%c0_6, %c0_7] : memref<128x128xbf16, #tpu.memory_space<vmem>>, vector<128x128xbf16>
    %cst_8 = arith.constant dense<0.000000e+00> : vector<256x128xf32>
    %7 = tpu.matmul %5, %6, %cst_8 {dimension_numbers = #tpu.dot_dimension_numbers<[1], [0], [0], [1], [0, 0, 1, 1], [], []>} : vector<256x128xbf16>, vector<128x128xbf16>, vector<256x128xf32> -> vector<256x128xf32>
    %8 = arith.maximumf %3, %7 : vector<256x128xf32>
    %c2 = arith.constant 2 : index
    %c0_9 = arith.constant 0 : index
    %c0_10 = arith.constant 0 : index
    %9 = vector.load %arg1[%c2, %c0_9, %c0_10] : memref<4x256x128xbf16, #tpu.memory_space<vmem>>, vector<1x256x128xbf16>
    %10 = vector.shape_cast %9 : vector<1x256x128xbf16> to vector<256x128xbf16>
    %c0_11 = arith.constant 0 : index
    %c0_12 = arith.constant 0 : index
    %11 = vector.load %arg2[%c0_11, %c0_12] : memref<128x128xbf16, #tpu.memory_space<vmem>>, vector<128x128xbf16>
    %cst_13 = arith.constant dense<0.000000e+00> : vector<256x128xf32>
    %12 = tpu.matmul %10, %11, %cst_13 {dimension_numbers = #tpu.dot_dimension_numbers<[1], [0], [0], [1], [0, 0, 1, 1], [], []>} : vector<256x128xbf16>, vector<128x128xbf16>, vector<256x128xf32> -> vector<256x128xf32>
    %13 = arith.maximumf %8, %12 : vector<256x128xf32>
    %c3 = arith.constant 3 : index
    %c0_14 = arith.constant 0 : index
    %c0_15 = arith.constant 0 : index
    %14 = vector.load %arg1[%c3, %c0_14, %c0_15] : memref<4x256x128xbf16, #tpu.memory_space<vmem>>, vector<1x256x128xbf16>
    %15 = vector.shape_cast %14 : vector<1x256x128xbf16> to vector<256x128xbf16>
    %c0_16 = arith.constant 0 : index
    %c0_17 = arith.constant 0 : index
    %16 = vector.load %arg2[%c0_16, %c0_17] : memref<128x128xbf16, #tpu.memory_space<vmem>>, vector<128x128xbf16>
    %cst_18 = arith.constant dense<0.000000e+00> : vector<256x128xf32>
    %17 = tpu.matmul %15, %16, %cst_18 {dimension_numbers = #tpu.dot_dimension_numbers<[1], [0], [0], [1], [0, 0, 1, 1], [], []>} : vector<256x128xbf16>, vector<128x128xbf16>, vector<256x128xf32> -> vector<256x128xf32>
    %18 = arith.maximumf %13, %17 : vector<256x128xf32>
    %c0_19 = arith.constant 0 : index
    %c0_20 = arith.constant 0 : index
    %19 = vector.load %arg3[%c0_19, %c0_20] : memref<1x128xf32, #tpu.memory_space<vmem>>, vector<1x128xf32>
    %20 = vector.broadcast %19 : vector<1x128xf32> to vector<256x128xf32>
    %21 = arith.addf %18, %20 : vector<256x128xf32>
    %cst_21 = arith.constant 0.000000e+00 : f32
    %22 = vector.broadcast %cst_21 : f32 to vector<256x128xf32>
    %23 = arith.maximumf %21, %22 : vector<256x128xf32>
    %24 = arith.truncf %23 : vector<256x128xf32> to vector<256x128xbf16>
    %c0_22 = arith.constant 0 : index
    %c0_23 = arith.constant 0 : index
    %25 = vector.load %arg4[%c0_22, %c0_23] : memref<256x128xbf16, #tpu.memory_space<vmem>>, vector<256x128xbf16>
    tpu.vector_store %arg4[%c0_22, %c0_23], %24 {strides = array<i32>} : memref<256x128xbf16, #tpu.memory_space<vmem>>, vector<256x128xbf16>,
    return
  }
  func.func @transform_0(%arg0: i32) -> (i32, i32, i32) {
    %c0_i32 = arith.constant 0 : i32
    %c0_i32_0 = arith.constant 0 : i32
    %c0_i32_1 = arith.constant 0 : i32
    return %c0_i32, %arg0, %c0_i32_0 : i32, i32, i32
  }
  func.func @transform_1(%arg0: i32) -> (i32, i32) {
    %c0_i32 = arith.constant 0 : i32
    %c0_i32_0 = arith.constant 0 : i32
    %c0_i32_1 = arith.constant 0 : i32
    return %c0_i32, %c0_i32_0 : i32, i32
  }
  func.func @transform_2(%arg0: i32) -> (i32, i32) {
    %c0_i32 = arith.constant 0 : i32
    %c0_i32_0 = arith.constant 0 : i32
    %c0_i32_1 = arith.constant 0 : i32
    return %c0_i32, %c0_i32_0 : i32, i32
  }
  func.func @transform_3(%arg0: i32) -> (i32, i32) {
    %c0_i32 = arith.constant 0 : i32
    %c0_i32_0 = arith.constant 0 : i32
    return %arg0, %c0_i32 : i32, i32
  }
}

module attributes {stable_mosaic.version = 11 : i64} {
  func.func @_conv_relu_pool_kernel(%arg0: i32, %arg1: memref<4x56x256xbf16, #tpu.memory_space<vmem>>, %arg2: memref<256x128xbf16, #tpu.memory_space<vmem>>, %arg3: memref<1x128xf32, #tpu.memory_space<vmem>>, %arg4: memref<56x128xbf16, #tpu.memory_space<vmem>>) attributes {dimension_semantics = [#tpu.dimension_semantics<parallel>], iteration_bounds = array<i64: 1>, scalar_prefetch = 0 : i64, scratch_operands = 0 : i64, tpu.core_type = #tpu.core_type<tc>, window_params = [{transform_indices = @transform_0, window_bounds = array<i64: 4, 56, 256>}, {pipeline_mode = #tpu.pipeline_mode<synchronous>, transform_indices = @transform_1, window_bounds = array<i64: 256, 128>}, {pipeline_mode = #tpu.pipeline_mode<synchronous>, transform_indices = @transform_2, window_bounds = array<i64: 1, 128>}, {transform_indices = @transform_3, window_bounds = array<i64: 56, 128>}]} {
    %c0 = arith.constant 0 : index
    %c0_0 = arith.constant 0 : index
    %c0_1 = arith.constant 0 : index
    %0 = vector.load %arg1[%c0, %c0_0, %c0_1] : memref<4x56x256xbf16, #tpu.memory_space<vmem>>, vector<1x56x256xbf16>
    %1 = vector.shape_cast %0 : vector<1x56x256xbf16> to vector<56x256xbf16>
    %c0_2 = arith.constant 0 : index
    %c0_3 = arith.constant 0 : index
    %2 = vector.load %arg2[%c0_2, %c0_3] : memref<256x128xbf16, #tpu.memory_space<vmem>>, vector<256x128xbf16>
    %cst = arith.constant dense<0.000000e+00> : vector<56x128xf32>
    %3 = tpu.matmul %1, %2, %cst {dimension_numbers = #tpu.dot_dimension_numbers<[1], [0], [0], [1], [0, 0, 1, 1], [], []>} : vector<56x256xbf16>, vector<256x128xbf16>, vector<56x128xf32> -> vector<56x128xf32>
    %c1 = arith.constant 1 : index
    %c0_4 = arith.constant 0 : index
    %c0_5 = arith.constant 0 : index
    %4 = vector.load %arg1[%c1, %c0_4, %c0_5] : memref<4x56x256xbf16, #tpu.memory_space<vmem>>, vector<1x56x256xbf16>
    %5 = vector.shape_cast %4 : vector<1x56x256xbf16> to vector<56x256xbf16>
    %c0_6 = arith.constant 0 : index
    %c0_7 = arith.constant 0 : index
    %6 = vector.load %arg2[%c0_6, %c0_7] : memref<256x128xbf16, #tpu.memory_space<vmem>>, vector<256x128xbf16>
    %cst_8 = arith.constant dense<0.000000e+00> : vector<56x128xf32>
    %7 = tpu.matmul %5, %6, %cst_8 {dimension_numbers = #tpu.dot_dimension_numbers<[1], [0], [0], [1], [0, 0, 1, 1], [], []>} : vector<56x256xbf16>, vector<256x128xbf16>, vector<56x128xf32> -> vector<56x128xf32>
    %8 = arith.maximumf %3, %7 : vector<56x128xf32>
    %c2 = arith.constant 2 : index
    %c0_9 = arith.constant 0 : index
    %c0_10 = arith.constant 0 : index
    %9 = vector.load %arg1[%c2, %c0_9, %c0_10] : memref<4x56x256xbf16, #tpu.memory_space<vmem>>, vector<1x56x256xbf16>
    %10 = vector.shape_cast %9 : vector<1x56x256xbf16> to vector<56x256xbf16>
    %c0_11 = arith.constant 0 : index
    %c0_12 = arith.constant 0 : index
    %11 = vector.load %arg2[%c0_11, %c0_12] : memref<256x128xbf16, #tpu.memory_space<vmem>>, vector<256x128xbf16>
    %cst_13 = arith.constant dense<0.000000e+00> : vector<56x128xf32>
    %12 = tpu.matmul %10, %11, %cst_13 {dimension_numbers = #tpu.dot_dimension_numbers<[1], [0], [0], [1], [0, 0, 1, 1], [], []>} : vector<56x256xbf16>, vector<256x128xbf16>, vector<56x128xf32> -> vector<56x128xf32>
    %13 = arith.maximumf %8, %12 : vector<56x128xf32>
    %c3 = arith.constant 3 : index
    %c0_14 = arith.constant 0 : index
    %c0_15 = arith.constant 0 : index
    %14 = vector.load %arg1[%c3, %c0_14, %c0_15] : memref<4x56x256xbf16, #tpu.memory_space<vmem>>, vector<1x56x256xbf16>
    %15 = vector.shape_cast %14 : vector<1x56x256xbf16> to vector<56x256xbf16>
    %c0_16 = arith.constant 0 : index
    %c0_17 = arith.constant 0 : index
    %16 = vector.load %arg2[%c0_16, %c0_17] : memref<256x128xbf16, #tpu.memory_space<vmem>>, vector<256x128xbf16>
    %cst_18 = arith.constant dense<0.000000e+00> : vector<56x128xf32>
    %17 = tpu.matmul %15, %16, %cst_18 {dimension_numbers = #tpu.dot_dimension_numbers<[1], [0], [0], [1], [0, 0, 1, 1], [], []>} : vector<56x256xbf16>, vector<256x128xbf16>, vector<56x128xf32> -> vector<56x128xf32>
    %18 = arith.maximumf %13, %17 : vector<56x128xf32>
    %c0_19 = arith.constant 0 : index
    %c0_20 = arith.constant 0 : index
    %19 = vector.load %arg3[%c0_19, %c0_20] : memref<1x128xf32, #tpu.memory_space<vmem>>, vector<1x128xf32>
    %20 = vector.broadcast %19 : vector<1x128xf32> to vector<56x128xf32>
    %21 = arith.addf %18, %20 : vector<56x128xf32>
    %cst_21 = arith.constant 0.000000e+00 : f32
    %22 = vector.broadcast %cst_21 : f32 to vector<56x128xf32>
    %23 = arith.maximumf %21, %22 : vector<56x128xf32>
    %24 = arith.truncf %23 : vector<56x128xf32> to vector<56x128xbf16>
    %c0_22 = arith.constant 0 : index
    %c0_23 = arith.constant 0 : index
    %25 = vector.load %arg4[%c0_22, %c0_23] : memref<56x128xbf16, #tpu.memory_space<vmem>>, vector<56x128xbf16>
    tpu.vector_store %arg4[%c0_22, %c0_23], %24 {strides = array<i32>} : memref<56x128xbf16, #tpu.memory_space<vmem>>, vector<56x128xbf16>,
    return
  }
  func.func @transform_0(%arg0: i32) -> (i32, i32, i32) {
    %c0_i32 = arith.constant 0 : i32
    %c0_i32_0 = arith.constant 0 : i32
    %c0_i32_1 = arith.constant 0 : i32
    return %c0_i32, %arg0, %c0_i32_0 : i32, i32, i32
  }
  func.func @transform_1(%arg0: i32) -> (i32, i32) {
    %c0_i32 = arith.constant 0 : i32
    %c0_i32_0 = arith.constant 0 : i32
    %c0_i32_1 = arith.constant 0 : i32
    return %c0_i32, %c0_i32_0 : i32, i32
  }
  func.func @transform_2(%arg0: i32) -> (i32, i32) {
    %c0_i32 = arith.constant 0 : i32
    %c0_i32_0 = arith.constant 0 : i32
    %c0_i32_1 = arith.constant 0 : i32
    return %c0_i32, %c0_i32_0 : i32, i32
  }
  func.func @transform_3(%arg0: i32) -> (i32, i32) {
    %c0_i32 = arith.constant 0 : i32
    %c0_i32_0 = arith.constant 0 : i32
    return %arg0, %c0_i32 : i32, i32
  }
}

module attributes {stable_mosaic.version = 11 : i64} {
  func.func @_fc_head_kernel(%arg0: i32, %arg1: memref<8x512xbf16, #tpu.memory_space<vmem>>, %arg2: memref<512x128xbf16, #tpu.memory_space<vmem>>, %arg3: memref<1x128xf32, #tpu.memory_space<vmem>>, %arg4: memref<128x128xbf16, #tpu.memory_space<vmem>>, %arg5: memref<1x128xf32, #tpu.memory_space<vmem>>, %arg6: memref<128x128xbf16, #tpu.memory_space<vmem>>, %arg7: memref<1x128xf32, #tpu.memory_space<vmem>>, %arg8: memref<8x128xf32, #tpu.memory_space<vmem>>) attributes {dimension_semantics = [#tpu.dimension_semantics<parallel>], iteration_bounds = array<i64: 1>, scalar_prefetch = 0 : i64, scratch_operands = 0 : i64, tpu.core_type = #tpu.core_type<tc>, window_params = [{transform_indices = @transform_0, window_bounds = array<i64: 8, 512>}, {pipeline_mode = #tpu.pipeline_mode<synchronous>, transform_indices = @transform_1, window_bounds = array<i64: 512, 128>}, {pipeline_mode = #tpu.pipeline_mode<synchronous>, transform_indices = @transform_2, window_bounds = array<i64: 1, 128>}, {pipeline_mode = #tpu.pipeline_mode<synchronous>, transform_indices = @transform_3, window_bounds = array<i64: 128, 128>}, {pipeline_mode = #tpu.pipeline_mode<synchronous>, transform_indices = @transform_4, window_bounds = array<i64: 1, 128>}, {pipeline_mode = #tpu.pipeline_mode<synchronous>, transform_indices = @transform_5, window_bounds = array<i64: 128, 128>}, {pipeline_mode = #tpu.pipeline_mode<synchronous>, transform_indices = @transform_6, window_bounds = array<i64: 1, 128>}, {transform_indices = @transform_7, window_bounds = array<i64: 8, 128>}]} {
    %c0 = arith.constant 0 : index
    %c0_0 = arith.constant 0 : index
    %0 = vector.load %arg1[%c0, %c0_0] : memref<8x512xbf16, #tpu.memory_space<vmem>>, vector<8x512xbf16>
    %c0_1 = arith.constant 0 : index
    %c0_2 = arith.constant 0 : index
    %1 = vector.load %arg2[%c0_1, %c0_2] : memref<512x128xbf16, #tpu.memory_space<vmem>>, vector<512x128xbf16>
    %cst = arith.constant dense<0.000000e+00> : vector<8x128xf32>
    %2 = tpu.matmul %0, %1, %cst {dimension_numbers = #tpu.dot_dimension_numbers<[1], [0], [0], [1], [0, 0, 1, 1], [], []>} : vector<8x512xbf16>, vector<512x128xbf16>, vector<8x128xf32> -> vector<8x128xf32>
    %c0_3 = arith.constant 0 : index
    %c0_4 = arith.constant 0 : index
    %3 = vector.load %arg3[%c0_3, %c0_4] : memref<1x128xf32, #tpu.memory_space<vmem>>, vector<1x128xf32>
    %4 = vector.broadcast %3 : vector<1x128xf32> to vector<8x128xf32>
    %5 = arith.addf %2, %4 : vector<8x128xf32>
    %cst_5 = arith.constant 0.000000e+00 : f32
    %6 = vector.broadcast %cst_5 : f32 to vector<8x128xf32>
    %7 = arith.maximumf %5, %6 : vector<8x128xf32>
    %8 = arith.truncf %7 : vector<8x128xf32> to vector<8x128xbf16>
    %c0_6 = arith.constant 0 : index
    %c0_7 = arith.constant 0 : index
    %9 = vector.load %arg4[%c0_6, %c0_7] : memref<128x128xbf16, #tpu.memory_space<vmem>>, vector<128x128xbf16>
    %cst_8 = arith.constant dense<0.000000e+00> : vector<8x128xf32>
    %10 = tpu.matmul %8, %9, %cst_8 {dimension_numbers = #tpu.dot_dimension_numbers<[1], [0], [0], [1], [0, 0, 1, 1], [], []>} : vector<8x128xbf16>, vector<128x128xbf16>, vector<8x128xf32> -> vector<8x128xf32>
    %c0_9 = arith.constant 0 : index
    %c0_10 = arith.constant 0 : index
    %11 = vector.load %arg5[%c0_9, %c0_10] : memref<1x128xf32, #tpu.memory_space<vmem>>, vector<1x128xf32>
    %12 = vector.broadcast %11 : vector<1x128xf32> to vector<8x128xf32>
    %13 = arith.addf %10, %12 : vector<8x128xf32>
    %cst_11 = arith.constant 0.000000e+00 : f32
    %14 = vector.broadcast %cst_11 : f32 to vector<8x128xf32>
    %15 = arith.maximumf %13, %14 : vector<8x128xf32>
    %16 = arith.truncf %15 : vector<8x128xf32> to vector<8x128xbf16>
    %c0_12 = arith.constant 0 : index
    %c0_13 = arith.constant 0 : index
    %17 = vector.load %arg6[%c0_12, %c0_13] : memref<128x128xbf16, #tpu.memory_space<vmem>>, vector<128x128xbf16>
    %cst_14 = arith.constant dense<0.000000e+00> : vector<8x128xf32>
    %18 = tpu.matmul %16, %17, %cst_14 {dimension_numbers = #tpu.dot_dimension_numbers<[1], [0], [0], [1], [0, 0, 1, 1], [], []>} : vector<8x128xbf16>, vector<128x128xbf16>, vector<8x128xf32> -> vector<8x128xf32>
    %c0_15 = arith.constant 0 : index
    %c0_16 = arith.constant 0 : index
    %19 = vector.load %arg7[%c0_15, %c0_16] : memref<1x128xf32, #tpu.memory_space<vmem>>, vector<1x128xf32>
    %20 = vector.broadcast %19 : vector<1x128xf32> to vector<8x128xf32>
    %21 = arith.addf %18, %20 : vector<8x128xf32>
    %c0_17 = arith.constant 0 : index
    %c0_18 = arith.constant 0 : index
    %22 = vector.load %arg8[%c0_17, %c0_18] : memref<8x128xf32, #tpu.memory_space<vmem>>, vector<8x128xf32>
    tpu.vector_store %arg8[%c0_17, %c0_18], %21 {strides = array<i32>} : memref<8x128xf32, #tpu.memory_space<vmem>>, vector<8x128xf32>,
    return
  }
  func.func @transform_0(%arg0: i32) -> (i32, i32) {
    %c0_i32 = arith.constant 0 : i32
    %c0_i32_0 = arith.constant 0 : i32
    return %arg0, %c0_i32 : i32, i32
  }
  func.func @transform_1(%arg0: i32) -> (i32, i32) {
    %c0_i32 = arith.constant 0 : i32
    %c0_i32_0 = arith.constant 0 : i32
    %c0_i32_1 = arith.constant 0 : i32
    return %c0_i32, %c0_i32_0 : i32, i32
  }
  func.func @transform_2(%arg0: i32) -> (i32, i32) {
    %c0_i32 = arith.constant 0 : i32
    %c0_i32_0 = arith.constant 0 : i32
    %c0_i32_1 = arith.constant 0 : i32
    return %c0_i32, %c0_i32_0 : i32, i32
  }
  func.func @transform_3(%arg0: i32) -> (i32, i32) {
    %c0_i32 = arith.constant 0 : i32
    %c0_i32_0 = arith.constant 0 : i32
    %c0_i32_1 = arith.constant 0 : i32
    return %c0_i32, %c0_i32_0 : i32, i32
  }
  func.func @transform_4(%arg0: i32) -> (i32, i32) {
    %c0_i32 = arith.constant 0 : i32
    %c0_i32_0 = arith.constant 0 : i32
    %c0_i32_1 = arith.constant 0 : i32
    return %c0_i32, %c0_i32_0 : i32, i32
  }
  func.func @transform_5(%arg0: i32) -> (i32, i32) {
    %c0_i32 = arith.constant 0 : i32
    %c0_i32_0 = arith.constant 0 : i32
    %c0_i32_1 = arith.constant 0 : i32
    return %c0_i32, %c0_i32_0 : i32, i32
  }
  func.func @transform_6(%arg0: i32) -> (i32, i32) {
    %c0_i32 = arith.constant 0 : i32
    %c0_i32_0 = arith.constant 0 : i32
    %c0_i32_1 = arith.constant 0 : i32
    return %c0_i32, %c0_i32_0 : i32, i32
  }
  func.func @transform_7(%arg0: i32) -> (i32, i32) {
    %c0_i32 = arith.constant 0 : i32
    %c0_i32_0 = arith.constant 0 : i32
    return %arg0, %c0_i32 : i32, i32
  }
}

</mosaic_0001>

<bundles_post_ra>
// kernel: net_forward.3
= control target key start
LH: loop header
LB: loop body
LE: loop exit
PB: predicated region body
PF: predicated region fallthrough
CT: control target
= control target key end

     0   :  { %s2584_s12 = smov 0   ;;  %s2586_s13 = smov 0   ;;  %s2913_s0 = inlined_call_operand.vmem [shape: bf16[4,512,128], index: 0, kind: input, shape index: {}]   ;;  %s2914_s1 = inlined_call_operand.vmem [shape: bf16[128,128], index: 1, kind: input, shape index: {}]   ;;  %s2915_s2 = inlined_call_operand.vmem [shape: f32[1,128], index: 2, kind: input, shape index: {}]   ;;  %s2916_s3 = inlined_call_operand.vmem [shape: bf16[512,128], index: 3, kind: output, shape index: {}]  }
   0x1   :  { %s2588_s14 = smov 0  }
   0x2 LB: > { %s1950_s15 = sadd.s32 4294967295, %s2562_s14   ;;  %s2601_s16 = sadd.s32 1, %s2562_s14   ;;  %s2562_s14 = sphi %s2588_s14, %s2919_s14   ;;  %s2558_s13 = sphi %s2586_s13, %s2918_s13   ;;  %s2554_s12 = sphi %s2584_s12, %s2917_s12  }
   0x3   : > { %s17_s17 = ssub.s32 %s2562_s14, %s2601_s16  ;;  %s20_s18 = sadd.s32 1, %s2558_s13 }
   0x4   : > { %p18_p0 = scmp.eq.s32.totalorder %s17_s17, 0  ;;  %p27_p1 = scmp.ne.s32.totalorder %s2558_s13, %s2554_s12 }
   0x5   : > { %p28_p2 = scmp.eq.s32.totalorder %s2562_s14, 0  ;;  %p1953_p4 = scmp.ge.s32.totalorder %s2562_s14, 2 }
   0x6   : > { %s2610_s19 = scalar_select %p18_p0, %s2558_s13, %s20_s18  }
   0x7   : > { %p29_p3 = por %p28_p2, %p27_p1  ;;  %127 = sbr.rel (%p1953_p4) target bundleno = 80 (0x50), region = 24 }
   0xc   : > { %130 = sbr.rel (!%p29_p3) target bundleno = 80 (0x50), region = 28  ;;  %s132_s20 = sand.u32 (%p29_p3), 1, %s2558_s13  }
   0xd   : > { %s2347_s21 = sshll.u32 (%p29_p3), %s2562_s14, 7  ;;  %s1954_s22 = sshll.u32 (%p29_p3), %s132_s20, 9 }
   0xe   : > { %s2618_s25 = scalar_lea.vmem (%p29_p3), %s2913_s0, %s2347_s21  ;;  %s2623_s26 = scalar_lea.vmem (%p29_p3), [#allocation2], %s1954_s22 }
   0xf   : > { %v154_v0 = vld [vmem:[%s2618_s25] sm:$0xff] (%p29_p3)   ;;  %v158_v1 = vld [vmem:[%s2618_s25 + $0x8] sm:$0xff] (%p29_p3)   ;;  %v162_v2 = vld [vmem:[%s2618_s25 + $0x10] sm:$0xff] (%p29_p3)  }
  0x10   : > { %155 = vst [vmem:[%s2623_s26] sm:$0xff] (%p29_p3), %v154_v0   ;;  %v166_v3 = vld [vmem:[%s2618_s25 + $0x18] sm:$0xff] (%p29_p3)   ;;  %v170_v4 = vld [vmem:[%s2618_s25 + $0x20] sm:$0xff] (%p29_p3)   ;;  %v174_v5 = vld [vmem:[%s2618_s25 + $0x28] sm:$0xff] (%p29_p3)  }
  0x11   : > { %159 = vst [vmem:[%s2623_s26 + $0x8] sm:$0xff] %v158_v1   ;;  %v178_v6 = vld [vmem:[%s2618_s25 + $0x30] sm:$0xff]   ;;  %v182_v7 = vld [vmem:[%s2618_s25 + $0x38] sm:$0xff]   ;;  %v186_v8 = vld [vmem:[%s2618_s25 + $0x40] sm:$0xff]  }
  0x12   : > { %163 = vst [vmem:[%s2623_s26 + $0x10] sm:$0xff] %v162_v2   ;;  %v190_v9 = vld [vmem:[%s2618_s25 + $0x48] sm:$0xff]   ;;  %v194_v10 = vld [vmem:[%s2618_s25 + $0x50] sm:$0xff]   ;;  %v198_v11 = vld [vmem:[%s2618_s25 + $0x58] sm:$0xff]  }
  0x13   : > { %167 = vst [vmem:[%s2623_s26 + $0x18] sm:$0xff] %v166_v3   ;;  %v202_v12 = vld [vmem:[%s2618_s25 + $0x60] sm:$0xff]   ;;  %v206_v13 = vld [vmem:[%s2618_s25 + $0x68] sm:$0xff]   ;;  %v210_v14 = vld [vmem:[%s2618_s25 + $0x70] sm:$0xff]  }
  0x14   : > { %171 = vst [vmem:[%s2623_s26 + $0x20] sm:$0xff] %v170_v4   ;;  %v214_v15 = vld [vmem:[%s2618_s25 + $0x78] sm:$0xff]   ;;  %v218_v16 = vld [vmem:[%s2618_s25 + $0x100] sm:$0xff]   ;;  %v222_v17 = vld [vmem:[%s2618_s25 + $0x108] sm:$0xff]  }
  0x15   : > { %175 = vst [vmem:[%s2623_s26 + $0x28] sm:$0xff] %v174_v5   ;;  %v226_v18 = vld [vmem:[%s2618_s25 + $0x110] sm:$0xff]   ;;  %v230_v19 = vld [vmem:[%s2618_s25 + $0x118] sm:$0xff]   ;;  %v234_v20 = vld [vmem:[%s2618_s25 + $0x120] sm:$0xff]  }
  0x16   : > { %179 = vst [vmem:[%s2623_s26 + $0x30] sm:$0xff] %v178_v6   ;;  %v238_v21 = vld [vmem:[%s2618_s25 + $0x128] sm:$0xff]   ;;  %v242_v22 = vld [vmem:[%s2618_s25 + $0x130] sm:$0xff]   ;;  %v246_v23 = vld [vmem:[%s2618_s25 + $0x138] sm:$0xff]  }
  0x17   : > { %183 = vst [vmem:[%s2623_s26 + $0x38] sm:$0xff] %v182_v7   ;;  %v250_v24 = vld [vmem:[%s2618_s25 + $0x140] sm:$0xff]   ;;  %v254_v25 = vld [vmem:[%s2618_s25 + $0x148] sm:$0xff]   ;;  %v258_v26 = vld [vmem:[%s2618_s25 + $0x150] sm:$0xff]  }
  0x18   : > { %187 = vst [vmem:[%s2623_s26 + $0x40] sm:$0xff] %v186_v8   ;;  %v262_v27 = vld [vmem:[%s2618_s25 + $0x158] sm:$0xff]   ;;  %v266_v28 = vld [vmem:[%s2618_s25 + $0x160] sm:$0xff]   ;;  %v270_v29 = vld [vmem:[%s2618_s25 + $0x168] sm:$0xff]  }
  0x19   : > { %191 = vst [vmem:[%s2623_s26 + $0x48] sm:$0xff] %v190_v9   ;;  %v274_v30 = vld [vmem:[%s2618_s25 + $0x170] sm:$0xff]   ;;  %v278_v31 = vld [vmem:[%s2618_s25 + $0x178] sm:$0xff]   ;;  %v282_v32 = vld [vmem:[%s2618_s25 + $0x200] sm:$0xff]  }
  0x1a   : > { %195 = vst [vmem:[%s2623_s26 + $0x50] sm:$0xff] %v194_v10   ;;  %v286_v33 = vld [vmem:[%s2618_s25 + $0x208] sm:$0xff]   ;;  %v290_v34 = vld [vmem:[%s2618_s25 + $0x210] sm:$0xff]   ;;  %v294_v35 = vld [vmem:[%s2618_s25 + $0x218] sm:$0xff]  }
  0x1b   : > { %199 = vst [vmem:[%s2623_s26 + $0x58] sm:$0xff] %v198_v11   ;;  %v298_v36 = vld [vmem:[%s2618_s25 + $0x220] sm:$0xff]   ;;  %v302_v37 = vld [vmem:[%s2618_s25 + $0x228] sm:$0xff]   ;;  %v306_v38 = vld [vmem:[%s2618_s25 + $0x230] sm:$0xff]  }
  0x1c   : > { %203 = vst [vmem:[%s2623_s26 + $0x60] sm:$0xff] %v202_v12   ;;  %v310_v39 = vld [vmem:[%s2618_s25 + $0x238] sm:$0xff]   ;;  %v314_v40 = vld [vmem:[%s2618_s25 + $0x240] sm:$0xff]   ;;  %v318_v41 = vld [vmem:[%s2618_s25 + $0x248] sm:$0xff]  }
  0x1d   : > { %207 = vst [vmem:[%s2623_s26 + $0x68] sm:$0xff] %v206_v13   ;;  %v322_v42 = vld [vmem:[%s2618_s25 + $0x250] sm:$0xff]   ;;  %v326_v43 = vld [vmem:[%s2618_s25 + $0x258] sm:$0xff]   ;;  %v330_v44 = vld [vmem:[%s2618_s25 + $0x260] sm:$0xff]  }
  0x1e   : > { %211 = vst [vmem:[%s2623_s26 + $0x70] sm:$0xff] %v210_v14   ;;  %v334_v45 = vld [vmem:[%s2618_s25 + $0x268] sm:$0xff]   ;;  %v338_v46 = vld [vmem:[%s2618_s25 + $0x270] sm:$0xff]   ;;  %v342_v47 = vld [vmem:[%s2618_s25 + $0x278] sm:$0xff]  }
  0x1f   : > { %215 = vst [vmem:[%s2623_s26 + $0x78] sm:$0xff] %v214_v15   ;;  %v346_v48 = vld [vmem:[%s2618_s25 + $0x300] sm:$0xff]   ;;  %v350_v49 = vld [vmem:[%s2618_s25 + $0x308] sm:$0xff]   ;;  %v354_v50 = vld [vmem:[%s2618_s25 + $0x310] sm:$0xff]  }
  0x20   : > { %219 = vst [vmem:[%s2623_s26 + $0x80] sm:$0xff] %v218_v16   ;;  %v358_v51 = vld [vmem:[%s2618_s25 + $0x318] sm:$0xff]   ;;  %v362_v52 = vld [vmem:[%s2618_s25 + $0x320] sm:$0xff]   ;;  %v366_v53 = vld [vmem:[%s2618_s25 + $0x328] sm:$0xff]  }
  0x21   : > { %223 = vst [vmem:[%s2623_s26 + $0x88] sm:$0xff] %v222_v17   ;;  %v370_v54 = vld [vmem:[%s2618_s25 + $0x330] sm:$0xff]   ;;  %v374_v55 = vld [vmem:[%s2618_s25 + $0x338] sm:$0xff]   ;;  %v378_v56 = vld [vmem:[%s2618_s25 + $0x340] sm:$0xff]  }
  0x22   : > { %227 = vst [vmem:[%s2623_s26 + $0x90] sm:$0xff] %v226_v18   ;;  %v382_v57 = vld [vmem:[%s2618_s25 + $0x348] sm:$0xff]   ;;  %v386_v58 = vld [vmem:[%s2618_s25 + $0x350] sm:$0xff]   ;;  %v390_v59 = vld [vmem:[%s2618_s25 + $0x358] sm:$0xff]  }
  0x23   : > { %231 = vst [vmem:[%s2623_s26 + $0x98] sm:$0xff] %v230_v19   ;;  %v394_v60 = vld [vmem:[%s2618_s25 + $0x360] sm:$0xff]   ;;  %v398_v61 = vld [vmem:[%s2618_s25 + $0x368] sm:$0xff]   ;;  %v402_v62 = vld [vmem:[%s2618_s25 + $0x370] sm:$0xff]  }
  0x24   : > { %235 = vst [vmem:[%s2623_s26 + $0xa0] sm:$0xff] %v234_v20   ;;  %v406_v63 = vld [vmem:[%s2618_s25 + $0x378] sm:$0xff]  }
  0x25   : > { %239 = vst [vmem:[%s2623_s26 + $0xa8] sm:$0xff] %v238_v21  }
  0x26   : > { %243 = vst [vmem:[%s2623_s26 + $0xb0] sm:$0xff] %v242_v22  }
  0x27   : > { %247 = vst [vmem:[%s2623_s26 + $0xb8] sm:$0xff] %v246_v23  }
  0x28   : > { %251 = vst [vmem:[%s2623_s26 + $0xc0] sm:$0xff] %v250_v24  }
  0x29   : > { %255 = vst [vmem:[%s2623_s26 + $0xc8] sm:$0xff] %v254_v25  }
  0x2a   : > { %259 = vst [vmem:[%s2623_s26 + $0xd0] sm:$0xff] %v258_v26  }
  0x2b   : > { %263 = vst [vmem:[%s2623_s26 + $0xd8] sm:$0xff] %v262_v27  }
  0x2c   : > { %267 = vst [vmem:[%s2623_s26 + $0xe0] sm:$0xff] %v266_v28  }
  0x2d   : > { %271 = vst [vmem:[%s2623_s26 + $0xe8] sm:$0xff] %v270_v29  }
  0x2e   : > { %275 = vst [vmem:[%s2623_s26 + $0xf0] sm:$0xff] %v274_v30  }
  0x2f   : > { %279 = vst [vmem:[%s2623_s26 + $0xf8] sm:$0xff] %v278_v31  }
  0x30   : > { %283 = vst [vmem:[%s2623_s26 + $0x100] sm:$0xff] %v282_v32  }
  0x31   : > { %287 = vst [vmem:[%s2623_s26 + $0x108] sm:$0xff] %v286_v33  }
  0x32   : > { %291 = vst [vmem:[%s2623_s26 + $0x110] sm:$0xff] %v290_v34  }
  0x33   : > { %295 = vst [vmem:[%s2623_s26 + $0x118] sm:$0xff] %v294_v35  }
  0x34   : > { %299 = vst [vmem:[%s2623_s26 + $0x120] sm:$0xff] %v298_v36  }
  0x35   : > { %303 = vst [vmem:[%s2623_s26 + $0x128] sm:$0xff] %v302_v37  }
  0x36   : > { %307 = vst [vmem:[%s2623_s26 + $0x130] sm:$0xff] %v306_v38  }
  0x37   : > { %311 = vst [vmem:[%s2623_s26 + $0x138] sm:$0xff] %v310_v39  }
  0x38   : > { %315 = vst [vmem:[%s2623_s26 + $0x140] sm:$0xff] %v314_v40  }
  0x39   : > { %319 = vst [vmem:[%s2623_s26 + $0x148] sm:$0xff] %v318_v41  }
  0x3a   : > { %323 = vst [vmem:[%s2623_s26 + $0x150] sm:$0xff] %v322_v42  }
  0x3b   : > { %327 = vst [vmem:[%s2623_s26 + $0x158] sm:$0xff] %v326_v43  }
  0x3c   : > { %331 = vst [vmem:[%s2623_s26 + $0x160] sm:$0xff] %v330_v44  }
  0x3d   : > { %335 = vst [vmem:[%s2623_s26 + $0x168] sm:$0xff] %v334_v45  }
  0x3e   : > { %339 = vst [vmem:[%s2623_s26 + $0x170] sm:$0xff] %v338_v46  }
  0x3f   : > { %343 = vst [vmem:[%s2623_s26 + $0x178] sm:$0xff] %v342_v47  }
  0x40   : > { %347 = vst [vmem:[%s2623_s26 + $0x180] sm:$0xff] %v346_v48  }
  0x41   : > { %351 = vst [vmem:[%s2623_s26 + $0x188] sm:$0xff] %v350_v49  }
  0x42   : > { %355 = vst [vmem:[%s2623_s26 + $0x190] sm:$0xff] %v354_v50  }
  0x43   : > { %359 = vst [vmem:[%s2623_s26 + $0x198] sm:$0xff] %v358_v51  }
  0x44   : > { %363 = vst [vmem:[%s2623_s26 + $0x1a0] sm:$0xff] %v362_v52  }
  0x45   : > { %367 = vst [vmem:[%s2623_s26 + $0x1a8] sm:$0xff] %v366_v53  }
  0x46   : > { %371 = vst [vmem:[%s2623_s26 + $0x1b0] sm:$0xff] %v370_v54  }
  0x47   : > { %375 = vst [vmem:[%s2623_s26 + $0x1b8] sm:$0xff] %v374_v55  }
  0x48   : > { %379 = vst [vmem:[%s2623_s26 + $0x1c0] sm:$0xff] %v378_v56  }
  0x49   : > { %383 = vst [vmem:[%s2623_s26 + $0x1c8] sm:$0xff] %v382_v57  }
  0x4a   : > { %387 = vst [vmem:[%s2623_s26 + $0x1d0] sm:$0xff] %v386_v58  }
  0x4b   : > { %391 = vst [vmem:[%s2623_s26 + $0x1d8] sm:$0xff] %v390_v59  }
  0x4c   : > { %395 = vst [vmem:[%s2623_s26 + $0x1e0] sm:$0xff] %v394_v60  }
  0x4d   : > { %399 = vst [vmem:[%s2623_s26 + $0x1e8] sm:$0xff] %v398_v61  }
  0x4e   : > { %403 = vst [vmem:[%s2623_s26 + $0x1f0] sm:$0xff] %v402_v62  }
  0x4f   : > { %407 = vst [vmem:[%s2623_s26 + $0x1f8] sm:$0xff] %v406_v63  }
  0x50 PF: > { %p1957_p5 = scmp.ge.s32.totalorder %s2562_s14, 1  ;;  %p688_p6 = scmp.lt.s32.totalorder %s2562_s14, 3 }
  0x52   : > { %p689_p7 = pnand %p1957_p5, %p688_p6 }
  0x53   : > { %s695_s17 = sand.u32 (!%p689_p7), 1, %s2554_s12   ;;  %s1959_s12 = sshll.u32 (!%p689_p7), %s1950_s15, 5 }
  0x54   : > { %692 = sbr.rel (%p689_p7) target bundleno = 513 (0x201), region = 69  ;;  %s1958_s21 = sshll.u32 (!%p689_p7), %s695_s17, 9 }
  0x55   : > { %s2777_s24 = scalar_lea.vmem (!%p689_p7), [#allocation2], %s1958_s21  ;;  %p720_p8 = scmp.lt.s32.totalorder (!%p689_p7), %s1959_s12, 63 }
  0x59   : > { %v2371_v0 = vld [vmem:[%s2914_s1 + $0x38] sm:$0xff]  ;;  %v2370_v1 = vld [vmem:[%s2914_s1 + $0x30] sm:$0xff]  ;;  %v2369_v2 = vld [vmem:[%s2914_s1 + $0x28] sm:$0xff]  ;;  %s2921_s12 = smov (!%p720_p8, %s1959_s12), 63 }
  0x5a   : > { %917 = vmatpush.bf16.msra.mxu0 %v2371_v0  ;;  %1135 = vmatpush.bf16.msra.mxu1 %v2371_v0  ;;  %v2368_v3 = vld [vmem:[%s2914_s1 + $0x20] sm:$0xff]  ;;  %v2367_v4 = vld [vmem:[%s2914_s1 + $0x18] sm:$0xff]  ;;  %v2366_v5 = vld [vmem:[%s2914_s1 + $0x10] sm:$0xff]  ;;  %s1960_s14 = sshll.u32 %s2921_s12, 2 }
  0x5b   : > { %1385 = vmatpush.bf16.msra.mxu2 %v2371_v0  ;;  %1635 = vmatpush.bf16.msra.mxu3 %v2371_v0  ;;  %v2365_v6 = vld [vmem:[%s2914_s1 + $0x8] sm:$0xff]  ;;  %v2364_v7 = vld [vmem:[%s2914_s1] sm:$0xff]  ;;  %v2350_v16 = vld [vmem:[%s2777_s24 + $0x10] sm:$0xff]  ;;  %s2831_s28 = scalar_lea.vmem %s2916_s3, %s1960_s14 }
  0x5c   : > { %v2348_v8 = vld [vmem:[%s2777_s24] sm:$0xff]  ;;  %v2349_v12 = vld [vmem:[%s2777_s24 + $0x8] sm:$0xff]  ;;  %v2374_v17 = vld [vmem:[%s2777_s24 + $0x90] sm:$0xff] }
  0x5d   : > { %v2372_v9 = vld [vmem:[%s2777_s24 + $0x80] sm:$0xff]  ;;  %v2373_v13 = vld [vmem:[%s2777_s24 + $0x88] sm:$0xff]  ;;  %v2390_v18 = vld [vmem:[%s2777_s24 + $0x110] sm:$0xff] }
  0x5e   : > { %918 = vmatpush.bf16.msra.mxu0 %v2370_v1  ;;  %1136 = vmatpush.bf16.msra.mxu1 %v2370_v1  ;;  %v2388_v10 = vld [vmem:[%s2777_s24 + $0x100] sm:$0xff]  ;;  %v2389_v14 = vld [vmem:[%s2777_s24 + $0x108] sm:$0xff]  ;;  %v2406_v19 = vld [vmem:[%s2777_s24 + $0x190] sm:$0xff] }
  0x5f   : > { %1386 = vmatpush.bf16.msra.mxu2 %v2370_v1  ;;  %1636 = vmatpush.bf16.msra.mxu3 %v2370_v1  ;;  %v2404_v11 = vld [vmem:[%s2777_s24 + $0x180] sm:$0xff]  ;;  %v2405_v15 = vld [vmem:[%s2777_s24 + $0x188] sm:$0xff]  ;;  %v2351_v20 = vld [vmem:[%s2777_s24 + $0x18] sm:$0xff] }
  0x60   : > { %v2375_v21 = vld [vmem:[%s2777_s24 + $0x98] sm:$0xff]  ;;  %v2352_v24 = vld [vmem:[%s2777_s24 + $0x20] sm:$0xff]  ;;  %v2353_v28 = vld [vmem:[%s2777_s24 + $0x28] sm:$0xff] }
  0x61   : > { %v2391_v22 = vld [vmem:[%s2777_s24 + $0x118] sm:$0xff]  ;;  %v2376_v25 = vld [vmem:[%s2777_s24 + $0xa0] sm:$0xff]  ;;  %v2377_v29 = vld [vmem:[%s2777_s24 + $0xa8] sm:$0xff] }
  0x62   : > { %919 = vmatpush.bf16.msra.mxu0 %v2369_v2  ;;  %1137 = vmatpush.bf16.msra.mxu1 %v2369_v2  ;;  %v2407_v23 = vld [vmem:[%s2777_s24 + $0x198] sm:$0xff]  ;;  %v2392_v26 = vld [vmem:[%s2777_s24 + $0x120] sm:$0xff]  ;;  %v2393_v30 = vld [vmem:[%s2777_s24 + $0x128] sm:$0xff] }
  0x63   : > { %1387 = vmatpush.bf16.msra.mxu2 %v2369_v2  ;;  %1637 = vmatpush.bf16.msra.mxu3 %v2369_v2  ;;  %v2408_v27 = vld [vmem:[%s2777_s24 + $0x1a0] sm:$0xff]  ;;  %v2409_v31 = vld [vmem:[%s2777_s24 + $0x1a8] sm:$0xff]  ;;  %v2354_v32 = vld [vmem:[%s2777_s24 + $0x30] sm:$0xff] }
  0x64   : > { %v2378_v33 = vld [vmem:[%s2777_s24 + $0xb0] sm:$0xff]  ;;  %v2355_v36 = vld [vmem:[%s2777_s24 + $0x38] sm:$0xff]  ;;  %v2356_v40 = vld [vmem:[%s2777_s24 + $0x40] sm:$0xff] }
  0x65   : > { %v2394_v34 = vld [vmem:[%s2777_s24 + $0x130] sm:$0xff]  ;;  %v2379_v37 = vld [vmem:[%s2777_s24 + $0xb8] sm:$0xff]  ;;  %v2380_v41 = vld [vmem:[%s2777_s24 + $0xc0] sm:$0xff] }
  0x66   : > { %920 = vmatpush.bf16.msra.mxu0 %v2368_v3  ;;  %1138 = vmatpush.bf16.msra.mxu1 %v2368_v3  ;;  %v2410_v35 = vld [vmem:[%s2777_s24 + $0x1b0] sm:$0xff]  ;;  %v2395_v38 = vld [vmem:[%s2777_s24 + $0x138] sm:$0xff]  ;;  %v2396_v44 = vld [vmem:[%s2777_s24 + $0x140] sm:$0xff] }
  0x67   : > { %1388 = vmatpush.bf16.msra.mxu2 %v2368_v3  ;;  %1638 = vmatpush.bf16.msra.mxu3 %v2368_v3  ;;  %v2411_v39 = vld [vmem:[%s2777_s24 + $0x1b8] sm:$0xff]  ;;  %v2412_v45 = vld [vmem:[%s2777_s24 + $0x1c0] sm:$0xff]  ;;  %v2357_v57 = vld [vmem:[%s2777_s24 + $0x48] sm:$0xff] }
  0x68   : > { %v2820_v53 = vld [vmem:[%s2915_s2] ss:$0 sm:$0xff]  ;;  %v2381_v58 = vld [vmem:[%s2777_s24 + $0xc8] sm:$0xff] }
  0x69   : > { %v2397_v62 = vld [vmem:[%s2777_s24 + $0x148] sm:$0xff] }
  0x6a   : > { %921 = vmatpush.bf16.msra.mxu0 %v2367_v4  ;;  %1139 = vmatpush.bf16.msra.mxu1 %v2367_v4  ;;  %v2413_v63 = vld [vmem:[%s2777_s24 + $0x1c8] sm:$0xff] }
  0x6b   : > { %1389 = vmatpush.bf16.msra.mxu2 %v2367_v4  ;;  %1639 = vmatpush.bf16.msra.mxu3 %v2367_v4 }
  0x6e   : > { %922 = vmatpush.bf16.msra.mxu0 %v2366_v5  ;;  %1140 = vmatpush.bf16.msra.mxu1 %v2366_v5 }
  0x6f   : > { %1390 = vmatpush.bf16.msra.mxu2 %v2366_v5  ;;  %1640 = vmatpush.bf16.msra.mxu3 %v2366_v5 }
  0x72   : > { %923 = vmatpush.bf16.msra.mxu0 %v2365_v6  ;;  %1141 = vmatpush.bf16.msra.mxu1 %v2365_v6 }
  0x73   : > { %1391 = vmatpush.bf16.msra.mxu2 %v2365_v6  ;;  %1641 = vmatpush.bf16.msra.mxu3 %v2365_v6 }
  0x76   : > { %924 = vmatpush.bf16.msra.mxu0 %v2364_v7  ;;  %1142 = vmatpush.bf16.msra.mxu1 %v2364_v7 }
  0x77   : > { %1392 = vmatpush.bf16.msra.mxu2 %v2364_v7  ;;  %1642 = vmatpush.bf16.msra.mxu3 %v2364_v7 }
  0x79   : > { %925 = vmatmul.bf16.vlgmr.msra.gmra.mxu0 %v2348_v8  ;;  %1143 = vmatmul.bf16.vlgmr.msra.gmra.mxu1 %v2372_v9 }
  0x7a   : > { %1393 = vmatmul.bf16.vlgmr.msra.gmra.mxu2 %v2388_v10  ;;  %1643 = vmatmul.bf16.vlgmr.msra.gmra.mxu3 %v2404_v11 }
  0x89   : > { %930 = vmatmul.bf16.gmra.mxu0 %v2349_v12  ;;  %1148 = vmatmul.bf16.gmra.mxu1 %v2373_v13 }
  0x8a   : > { %1398 = vmatmul.bf16.gmra.mxu2 %v2389_v14  ;;  %1648 = vmatmul.bf16.gmra.mxu3 %v2405_v15 }
  0x99   : > { %935 = vmatmul.bf16.gmra.mxu0 %v2350_v16  ;;  %1153 = vmatmul.bf16.gmra.mxu1 %v2374_v17  ;;  %v2358_v16 = vld [vmem:[%s2777_s24 + $0x50] sm:$0xff] }
  0x9a   : > { %1403 = vmatmul.bf16.gmra.mxu2 %v2390_v18  ;;  %1653 = vmatmul.bf16.gmra.mxu3 %v2406_v19  ;;  %v2382_v17 = vld [vmem:[%s2777_s24 + $0xd0] sm:$0xff] }
  0xa9   : > { %940 = vmatmul.bf16.gmra.mxu0 %v2351_v20  ;;  %1158 = vmatmul.bf16.gmra.mxu1 %v2375_v21  ;;  %v2398_v21 = vld [vmem:[%s2777_s24 + $0x150] sm:$0xff] }
  0xaa   : > { %1408 = vmatmul.bf16.gmra.mxu2 %v2391_v22  ;;  %1658 = vmatmul.bf16.gmra.mxu3 %v2407_v23  ;;  %v2414_v22 = vld [vmem:[%s2777_s24 + $0x1d0] sm:$0xff] }
  0xb9   : > { %945 = vmatmul.bf16.gmra.mxu0 %v2352_v24  ;;  %1163 = vmatmul.bf16.gmra.mxu1 %v2376_v25 }
  0xba   : > { %1413 = vmatmul.bf16.gmra.mxu2 %v2392_v26  ;;  %1663 = vmatmul.bf16.gmra.mxu3 %v2408_v27 }
  0xc9   : > { %950 = vmatmul.bf16.gmra.mxu0 %v2353_v28  ;;  %1168 = vmatmul.bf16.gmra.mxu1 %v2377_v29 }
  0xca   : > { %1418 = vmatmul.bf16.gmra.mxu2 %v2393_v30  ;;  %1668 = vmatmul.bf16.gmra.mxu3 %v2409_v31 }
  0xd9   : > { %955 = vmatmul.bf16.gmra.mxu0 %v2354_v32  ;;  %1173 = vmatmul.bf16.gmra.mxu1 %v2378_v33 }
  0xda   : > { %1423 = vmatmul.bf16.gmra.mxu2 %v2394_v34  ;;  %1673 = vmatmul.bf16.gmra.mxu3 %v2410_v35 }
  0xe9   : > { %960 = vmatmul.bf16.gmra.mxu0 %v2355_v36  ;;  %1178 = vmatmul.bf16.gmra.mxu1 %v2379_v37 }
  0xea   : > { %1428 = vmatmul.bf16.gmra.mxu2 %v2395_v38  ;;  %1678 = vmatmul.bf16.gmra.mxu3 %v2411_v39  ;;  %v2359_v39 = vld [vmem:[%s2777_s24 + $0x58] sm:$0xff] }
  0xf6   : > { %v926_v42 = vpop.f32.mrf.mxu0  ;;  %v1144_v43 = vpop.f32.mrf.mxu1 }
  0xf7   : > { %v1224_v46 = vmax.f32 %v926_v42, %v1144_v43 }
  0xf9   : > { %965 = vmatmul.bf16.gmra.mxu0 %v2356_v40  ;;  %1183 = vmatmul.bf16.gmra.mxu1 %v2380_v41  ;;  %v2383_v40 = vld [vmem:[%s2777_s24 + $0xd8] sm:$0xff] }
  0xfa   : > { %1433 = vmatmul.bf16.gmra.mxu2 %v2396_v44  ;;  %1683 = vmatmul.bf16.gmra.mxu3 %v2412_v45  ;;  %v2399_v44 = vld [vmem:[%s2777_s24 + $0x158] sm:$0xff] }
  0xfb   : > { %v2415_v45 = vld [vmem:[%s2777_s24 + $0x1d8] sm:$0xff] }
  0xfd   : > { %v1394_v47 = vpop.f32.mrf.mxu2  ;;  %v1644_v48 = vpop.f32.mrf.mxu3 }
  0xfe   : > { %v928_v49 = vpop.f32.mrf.mxu0  ;;  %v1146_v50 = vpop.f32.mrf.mxu1  ;;  %v1474_v51 = vmax.f32 %v1224_v46, %v1394_v47 }
  0xff   : > { %v1225_v54 = vmax.f32 %v928_v49, %v1146_v50 }
 0x100   : > { %v1724_v52 = vmax.f32 %v1474_v51, %v1644_v48 }
 0x102   : > { %v1760_v0 = vadd.f32 %v2820_v53, %v1724_v52 }
 0x104   : > { %v1792_v3 = vmax.f32 %v1760_v0, 0.0  ;;  %v2384_v0 = vld [vmem:[%s2777_s24 + $0xe0] sm:$0xff] }
 0x105   : > { %v1396_v55 = vpop.f32.mrf.mxu2  ;;  %v1646_v56 = vpop.f32.mrf.mxu3 }
 0x106   : > { %v1475_v59 = vmax.f32 %v1225_v54, %v1396_v55  ;;  %v931_v60 = vpop.f32.mrf.mxu0  ;;  %v1149_v61 = vpop.f32.mrf.mxu1 }
 0x107   : > { %v1226_v5 = vmax.f32 %v931_v60, %v1149_v61 }
 0x108   : > { %v1725_v1 = vmax.f32 %v1475_v59, %v1646_v56 }
 0x109   : > { %970 = vmatmul.bf16.gmra.mxu0 %v2357_v57  ;;  %1188 = vmatmul.bf16.gmra.mxu1 %v2381_v58 }
 0x10a   : > { %v1761_v2 = vadd.f32 %v2820_v53, %v1725_v1  ;;  %1438 = vmatmul.bf16.gmra.mxu2 %v2397_v62  ;;  %1688 = vmatmul.bf16.gmra.mxu3 %v2413_v63  ;;  %v2360_v63 = vld [vmem:[%s2777_s24 + $0x60] sm:$0xff] }
 0x10c   : > { %v1793_v4 = vmax.f32 %v1761_v2, 0.0 }
 0x10d   : > { %v1399_v6 = vpop.f32.mrf.mxu2  ;;  %v1649_v7 = vpop.f32.mrf.mxu3 }
 0x10e   : > { %v2423_v8 = vpack.c.bf16 %v1793_v4, %v1792_v3  ;;  %v933_v9 = vpop.f32.mrf.mxu0  ;;  %v1151_v10 = vpop.f32.mrf.mxu1  ;;  %v1476_v11 = vmax.f32 %v1226_v5, %v1399_v6  ;;  %v2400_v4 = vld [vmem:[%s2777_s24 + $0x160] sm:$0xff] }
 0x10f   : > { %v1227_v13 = vmax.f32 %v933_v9, %v1151_v10  ;;  %v2416_v5 = vld [vmem:[%s2777_s24 + $0x1e0] sm:$0xff] }
 0x110   : > { %2424 = vst [vmem:[%s2831_s28] sm:$0xff] %v2423_v8   ;;  %v1726_v12 = vmax.f32 %v1476_v11, %v1649_v7 }
 0x112   : > { %v1762_v23 = vadd.f32 %v2820_v53, %v1726_v12 }
 0x114   : > { %v1794_v26 = vmax.f32 %v1762_v23, 0.0  ;;  %v2385_v23 = vld [vmem:[%s2777_s24 + $0xe8] sm:$0xff] }
 0x115   : > { %v1401_v14 = vpop.f32.mrf.mxu2  ;;  %v1651_v15 = vpop.f32.mrf.mxu3 }
 0x116   : > { %v1477_v18 = vmax.f32 %v1227_v13, %v1401_v14  ;;  %v936_v19 = vpop.f32.mrf.mxu0  ;;  %v1154_v20 = vpop.f32.mrf.mxu1 }
 0x117   : > { %v1228_v28 = vmax.f32 %v936_v19, %v1154_v20 }
 0x118   : > { %v1727_v24 = vmax.f32 %v1477_v18, %v1651_v15 }
 0x119   : > { %975 = vmatmul.bf16.gmra.mxu0 %v2358_v16  ;;  %1193 = vmatmul.bf16.gmra.mxu1 %v2382_v17 }
 0x11a   : > { %v1763_v25 = vadd.f32 %v2820_v53, %v1727_v24  ;;  %1443 = vmatmul.bf16.gmra.mxu2 %v2398_v21  ;;  %1693 = vmatmul.bf16.gmra.mxu3 %v2414_v22  ;;  %v2361_v22 = vld [vmem:[%s2777_s24 + $0x68] sm:$0xff] }
 0x11c   : > { %v1795_v27 = vmax.f32 %v1763_v25, 0.0 }
 0x11d   : > { %v1404_v29 = vpop.f32.mrf.mxu2  ;;  %v1654_v30 = vpop.f32.mrf.mxu3 }
 0x11e   : > { %v2428_v31 = vpack.c.bf16 %v1795_v27, %v1794_v26  ;;  %v938_v32 = vpop.f32.mrf.mxu0  ;;  %v1156_v33 = vpop.f32.mrf.mxu1  ;;  %v1478_v34 = vmax.f32 %v1228_v28, %v1404_v29  ;;  %v2401_v27 = vld [vmem:[%s2777_s24 + $0x168] sm:$0xff] }
 0x11f   : > { %v1229_v36 = vmax.f32 %v938_v32, %v1156_v33  ;;  %v2417_v28 = vld [vmem:[%s2777_s24 + $0x1e8] sm:$0xff] }
 0x120   : > { %2500 = vst [vmem:[%s2831_s28 + $0x8] sm:$0xff] %v2428_v31   ;;  %v1728_v35 = vmax.f32 %v1478_v34, %v1654_v30 }
 0x122   : > { %v1764_v46 = vadd.f32 %v2820_v53, %v1728_v35 }
 0x124   : > { %v1796_v49 = vmax.f32 %v1764_v46, 0.0  ;;  %v2386_v46 = vld [vmem:[%s2777_s24 + $0xf0] sm:$0xff] }
 0x125   : > { %v1406_v37 = vpop.f32.mrf.mxu2  ;;  %v1656_v38 = vpop.f32.mrf.mxu3 }
 0x126   : > { %v1479_v41 = vmax.f32 %v1229_v36, %v1406_v37  ;;  %v941_v42 = vpop.f32.mrf.mxu0  ;;  %v1159_v43 = vpop.f32.mrf.mxu1 }
 0x127   : > { %v1230_v51 = vmax.f32 %v941_v42, %v1159_v43 }
 0x128   : > { %v1729_v47 = vmax.f32 %v1479_v41, %v1656_v38 }
 0x129   : > { %980 = vmatmul.bf16.gmra.mxu0 %v2359_v39  ;;  %1198 = vmatmul.bf16.gmra.mxu1 %v2383_v40 }
 0x12a   : > { %v1765_v48 = vadd.f32 %v2820_v53, %v1729_v47  ;;  %1448 = vmatmul.bf16.gmra.mxu2 %v2399_v44  ;;  %1698 = vmatmul.bf16.gmra.mxu3 %v2415_v45  ;;  %v2362_v45 = vld [vmem:[%s2777_s24 + $0x70] sm:$0xff] }
 0x12c   : > { %v1797_v50 = vmax.f32 %v1765_v48, 0.0 }
 0x12d   : > { %v1409_v52 = vpop.f32.mrf.mxu2  ;;  %v1659_v54 = vpop.f32.mrf.mxu3 }
 0x12e   : > { %v2433_v55 = vpack.c.bf16 %v1797_v50, %v1796_v49  ;;  %v943_v56 = vpop.f32.mrf.mxu0  ;;  %v1161_v57 = vpop.f32.mrf.mxu1  ;;  %v1480_v58 = vmax.f32 %v1230_v51, %v1409_v52  ;;  %v2402_v50 = vld [vmem:[%s2777_s24 + $0x170] sm:$0xff] }
 0x12f   : > { %v1231_v60 = vmax.f32 %v943_v56, %v1161_v57  ;;  %v2418_v51 = vld [vmem:[%s2777_s24 + $0x1f0] sm:$0xff] }
 0x130   : > { %2501 = vst [vmem:[%s2831_s28 + $0x10] sm:$0xff] %v2433_v55   ;;  %v1730_v59 = vmax.f32 %v1480_v58, %v1659_v54 }
 0x132   : > { %v1766_v6 = vadd.f32 %v2820_v53, %v1730_v59 }
 0x134   : > { %v1798_v9 = vmax.f32 %v1766_v6, 0.0  ;;  %v2387_v6 = vld [vmem:[%s2777_s24 + $0xf8] sm:$0xff] }
 0x135   : > { %v1411_v61 = vpop.f32.mrf.mxu2  ;;  %v1661_v62 = vpop.f32.mrf.mxu3 }
 0x136   : > { %v1481_v1 = vmax.f32 %v1231_v60, %v1411_v61  ;;  %v946_v2 = vpop.f32.mrf.mxu0  ;;  %v1164_v3 = vpop.f32.mrf.mxu1 }
 0x137   : > { %v1232_v11 = vmax.f32 %v946_v2, %v1164_v3 }
 0x138   : > { %v1731_v7 = vmax.f32 %v1481_v1, %v1661_v62 }
 0x139   : > { %985 = vmatmul.bf16.gmra.mxu0 %v2360_v63  ;;  %1203 = vmatmul.bf16.gmra.mxu1 %v2384_v0 }
 0x13a   : > { %v1767_v8 = vadd.f32 %v2820_v53, %v1731_v7  ;;  %1453 = vmatmul.bf16.gmra.mxu2 %v2400_v4  ;;  %1703 = vmatmul.bf16.gmra.mxu3 %v2416_v5  ;;  %v2363_v5 = vld [vmem:[%s2777_s24 + $0x78] sm:$0xff] }
 0x13c   : > { %v1799_v10 = vmax.f32 %v1767_v8, 0.0 }
 0x13d   : > { %v1414_v12 = vpop.f32.mrf.mxu2  ;;  %v1664_v13 = vpop.f32.mrf.mxu3 }
 0x13e   : > { %v2438_v14 = vpack.c.bf16 %v1799_v10, %v1798_v9  ;;  %v948_v15 = vpop.f32.mrf.mxu0  ;;  %v1166_v16 = vpop.f32.mrf.mxu1  ;;  %v1482_v17 = vmax.f32 %v1232_v11, %v1414_v12  ;;  %v2403_v10 = vld [vmem:[%s2777_s24 + $0x178] sm:$0xff] }
 0x13f   : > { %v1233_v19 = vmax.f32 %v948_v15, %v1166_v16  ;;  %v2419_v11 = vld [vmem:[%s2777_s24 + $0x1f8] sm:$0xff] }
 0x140   : > { %2502 = vst [vmem:[%s2831_s28 + $0x18] sm:$0xff] %v2438_v14   ;;  %v1732_v18 = vmax.f32 %v1482_v17, %v1664_v13 }
 0x142   : > { %v1768_v29 = vadd.f32 %v2820_v53, %v1732_v18 }
 0x144   : > { %v1800_v32 = vmax.f32 %v1768_v29, 0.0 }
 0x145   : > { %v1416_v20 = vpop.f32.mrf.mxu2  ;;  %v1666_v21 = vpop.f32.mrf.mxu3 }
 0x146   : > { %v1483_v24 = vmax.f32 %v1233_v19, %v1416_v20  ;;  %v951_v25 = vpop.f32.mrf.mxu0  ;;  %v1169_v26 = vpop.f32.mrf.mxu1 }
 0x147   : > { %v1234_v34 = vmax.f32 %v951_v25, %v1169_v26 }
 0x148   : > { %v1733_v30 = vmax.f32 %v1483_v24, %v1666_v21 }
 0x149   : > { %990 = vmatmul.bf16.gmra.mxu0 %v2361_v22  ;;  %1208 = vmatmul.bf16.gmra.mxu1 %v2385_v23 }
 0x14a   : > { %v1769_v31 = vadd.f32 %v2820_v53, %v1733_v30  ;;  %1458 = vmatmul.bf16.gmra.mxu2 %v2401_v27  ;;  %1708 = vmatmul.bf16.gmra.mxu3 %v2417_v28 }
 0x14c   : > { %v1801_v33 = vmax.f32 %v1769_v31, 0.0 }
 0x14d   : > { %v1419_v35 = vpop.f32.mrf.mxu2  ;;  %v1669_v36 = vpop.f32.mrf.mxu3 }
 0x14e   : > { %v2443_v37 = vpack.c.bf16 %v1801_v33, %v1800_v32  ;;  %v953_v38 = vpop.f32.mrf.mxu0  ;;  %v1171_v39 = vpop.f32.mrf.mxu1  ;;  %v1484_v40 = vmax.f32 %v1234_v34, %v1419_v35 }
 0x14f   : > { %v1235_v42 = vmax.f32 %v953_v38, %v1171_v39 }
 0x150   : > { %2503 = vst [vmem:[%s2831_s28 + $0x20] sm:$0xff] %v2443_v37   ;;  %v1734_v41 = vmax.f32 %v1484_v40, %v1669_v36 }
 0x152   : > { %v1770_v52 = vadd.f32 %v2820_v53, %v1734_v41 }
 0x154   : > { %v1802_v56 = vmax.f32 %v1770_v52, 0.0 }
 0x155   : > { %v1421_v43 = vpop.f32.mrf.mxu2  ;;  %v1671_v44 = vpop.f32.mrf.mxu3 }
 0x156   : > { %v1485_v47 = vmax.f32 %v1235_v42, %v1421_v43  ;;  %v956_v48 = vpop.f32.mrf.mxu0  ;;  %v1174_v49 = vpop.f32.mrf.mxu1 }
 0x157   : > { %v1236_v58 = vmax.f32 %v956_v48, %v1174_v49 }
 0x158   : > { %v1735_v54 = vmax.f32 %v1485_v47, %v1671_v44 }
 0x159   : > { %995 = vmatmul.bf16.gmra.mxu0 %v2362_v45  ;;  %1213 = vmatmul.bf16.gmra.mxu1 %v2386_v46 }
 0x15a   : > { %v1771_v55 = vadd.f32 %v2820_v53, %v1735_v54  ;;  %1463 = vmatmul.bf16.gmra.mxu2 %v2402_v50  ;;  %1713 = vmatmul.bf16.gmra.mxu3 %v2418_v51 }
 0x15c   : > { %v1803_v57 = vmax.f32 %v1771_v55, 0.0 }
 0x15d   : > { %v1424_v59 = vpop.f32.mrf.mxu2  ;;  %v1674_v60 = vpop.f32.mrf.mxu3 }
 0x15e   : > { %v2448_v61 = vpack.c.bf16 %v1803_v57, %v1802_v56  ;;  %v958_v62 = vpop.f32.mrf.mxu0  ;;  %v1176_v63 = vpop.f32.mrf.mxu1  ;;  %v1486_v0 = vmax.f32 %v1236_v58, %v1424_v59 }
 0x15f   : > { %v1237_v2 = vmax.f32 %v958_v62, %v1176_v63 }
 0x160   : > { %2504 = vst [vmem:[%s2831_s28 + $0x28] sm:$0xff] %v2448_v61   ;;  %v1736_v1 = vmax.f32 %v1486_v0, %v1674_v60 }
 0x162   : > { %v1772_v12 = vadd.f32 %v2820_v53, %v1736_v1 }
 0x164   : > { %v1804_v15 = vmax.f32 %v1772_v12, 0.0 }
 0x165   : > { %v1426_v3 = vpop.f32.mrf.mxu2  ;;  %v1676_v4 = vpop.f32.mrf.mxu3 }
 0x166   : > { %v1487_v7 = vmax.f32 %v1237_v2, %v1426_v3  ;;  %v961_v8 = vpop.f32.mrf.mxu0  ;;  %v1179_v9 = vpop.f32.mrf.mxu1 }
 0x167   : > { %v1238_v17 = vmax.f32 %v961_v8, %v1179_v9 }
 0x168   : > { %v1737_v13 = vmax.f32 %v1487_v7, %v1676_v4 }
 0x169   : > { %1000 = vmatmul.bf16.gmra.mxu0 %v2363_v5  ;;  %1218 = vmatmul.bf16.gmra.mxu1 %v2387_v6 }
 0x16a   : > { %v1773_v14 = vadd.f32 %v2820_v53, %v1737_v13  ;;  %1468 = vmatmul.bf16.gmra.mxu2 %v2403_v10  ;;  %1718 = vmatmul.bf16.gmra.mxu3 %v2419_v11 }
 0x16c   : > { %v1805_v16 = vmax.f32 %v1773_v14, 0.0 }
 0x16d   : > { %v1429_v18 = vpop.f32.mrf.mxu2  ;;  %v1679_v19 = vpop.f32.mrf.mxu3 }
 0x16e   : > { %v2453_v20 = vpack.c.bf16 %v1805_v16, %v1804_v15  ;;  %v963_v21 = vpop.f32.mrf.mxu0  ;;  %v1181_v22 = vpop.f32.mrf.mxu1  ;;  %v1488_v23 = vmax.f32 %v1238_v17, %v1429_v18 }
 0x16f   : > { %v1239_v25 = vmax.f32 %v963_v21, %v1181_v22 }
 0x170   : > { %2505 = vst [vmem:[%s2831_s28 + $0x30] sm:$0xff] %v2453_v20   ;;  %v1738_v24 = vmax.f32 %v1488_v23, %v1679_v19 }
 0x172   : > { %v1774_v31 = vadd.f32 %v2820_v53, %v1738_v24 }
 0x174   : > { %v1806_v34 = vmax.f32 %v1774_v31, 0.0 }
 0x175   : > { %v1431_v26 = vpop.f32.mrf.mxu2  ;;  %v1681_v27 = vpop.f32.mrf.mxu3 }
 0x176   : > { %v1489_v28 = vmax.f32 %v1239_v25, %v1431_v26  ;;  %v966_v29 = vpop.f32.mrf.mxu0  ;;  %v1184_v30 = vpop.f32.mrf.mxu1 }
 0x177   : > { %v1240_v36 = vmax.f32 %v966_v29, %v1184_v30 }
 0x178   : > { %v1739_v32 = vmax.f32 %v1489_v28, %v1681_v27 }
 0x17a   : > { %v1775_v33 = vadd.f32 %v2820_v53, %v1739_v32 }
 0x17c   : > { %v1807_v35 = vmax.f32 %v1775_v33, 0.0 }
 0x17d   : > { %v1434_v37 = vpop.f32.mrf.mxu2  ;;  %v1684_v38 = vpop.f32.mrf.mxu3 }
 0x17e   : > { %v2458_v39 = vpack.c.bf16 %v1807_v35, %v1806_v34  ;;  %v968_v40 = vpop.f32.mrf.mxu0  ;;  %v1186_v41 = vpop.f32.mrf.mxu1  ;;  %v1490_v42 = vmax.f32 %v1240_v36, %v1434_v37 }
 0x17f   : > { %v1241_v44 = vmax.f32 %v968_v40, %v1186_v41 }
 0x180   : > { %2506 = vst [vmem:[%s2831_s28 + $0x38] sm:$0xff] %v2458_v39   ;;  %v1740_v43 = vmax.f32 %v1490_v42, %v1684_v38 }
 0x182   : > { %v1776_v50 = vadd.f32 %v2820_v53, %v1740_v43 }
 0x184   : > { %v1808_v54 = vmax.f32 %v1776_v50, 0.0 }
 0x185   : > { %v1436_v45 = vpop.f32.mrf.mxu2  ;;  %v1686_v46 = vpop.f32.mrf.mxu3 }
 0x186   : > { %v1491_v47 = vmax.f32 %v1241_v44, %v1436_v45  ;;  %v971_v48 = vpop.f32.mrf.mxu0  ;;  %v1189_v49 = vpop.f32.mrf.mxu1 }
 0x187   : > { %v1242_v56 = vmax.f32 %v971_v48, %v1189_v49 }
 0x188   : > { %v1741_v51 = vmax.f32 %v1491_v47, %v1686_v46 }
 0x18a   : > { %v1777_v52 = vadd.f32 %v2820_v53, %v1741_v51 }
 0x18c   : > { %v1809_v55 = vmax.f32 %v1777_v52, 0.0 }
 0x18d   : > { %v1439_v57 = vpop.f32.mrf.mxu2  ;;  %v1689_v58 = vpop.f32.mrf.mxu3 }
 0x18e   : > { %v2463_v59 = vpack.c.bf16 %v1809_v55, %v1808_v54  ;;  %v973_v60 = vpop.f32.mrf.mxu0  ;;  %v1191_v61 = vpop.f32.mrf.mxu1  ;;  %v1492_v62 = vmax.f32 %v1242_v56, %v1439_v57 }
 0x18f   : > { %v1243_v0 = vmax.f32 %v973_v60, %v1191_v61 }
 0x190   : > { %2507 = vst [vmem:[%s2831_s28 + $0x40] sm:$0xff] %v2463_v59   ;;  %v1742_v63 = vmax.f32 %v1492_v62, %v1689_v58 }
 0x192   : > { %v1778_v6 = vadd.f32 %v2820_v53, %v1742_v63 }
 0x194   : > { %v1810_v9 = vmax.f32 %v1778_v6, 0.0 }
 0x195   : > { %v1441_v1 = vpop.f32.mrf.mxu2  ;;  %v1691_v2 = vpop.f32.mrf.mxu3 }
 0x196   : > { %v1493_v3 = vmax.f32 %v1243_v0, %v1441_v1  ;;  %v976_v4 = vpop.f32.mrf.mxu0  ;;  %v1194_v5 = vpop.f32.mrf.mxu1 }
 0x197   : > { %v1244_v11 = vmax.f32 %v976_v4, %v1194_v5 }
 0x198   : > { %v1743_v7 = vmax.f32 %v1493_v3, %v1691_v2 }
 0x19a   : > { %v1779_v8 = vadd.f32 %v2820_v53, %v1743_v7 }
 0x19c   : > { %v1811_v10 = vmax.f32 %v1779_v8, 0.0 }
 0x19d   : > { %v1444_v12 = vpop.f32.mrf.mxu2  ;;  %v1694_v13 = vpop.f32.mrf.mxu3 }
 0x19e   : > { %v2468_v14 = vpack.c.bf16 %v1811_v10, %v1810_v9  ;;  %v978_v15 = vpop.f32.mrf.mxu0  ;;  %v1196_v16 = vpop.f32.mrf.mxu1  ;;  %v1494_v17 = vmax.f32 %v1244_v11, %v1444_v12 }
 0x19f   : > { %v1245_v19 = vmax.f32 %v978_v15, %v1196_v16 }
 0x1a0   : > { %2508 = vst [vmem:[%s2831_s28 + $0x48] sm:$0xff] %v2468_v14   ;;  %v1744_v18 = vmax.f32 %v1494_v17, %v1694_v13 }
 0x1a2   : > { %v1780_v25 = vadd.f32 %v2820_v53, %v1744_v18 }
 0x1a4   : > { %v1812_v28 = vmax.f32 %v1780_v25, 0.0 }
 0x1a5   : > { %v1446_v20 = vpop.f32.mrf.mxu2  ;;  %v1696_v21 = vpop.f32.mrf.mxu3 }
 0x1a6   : > { %v1495_v22 = vmax.f32 %v1245_v19, %v1446_v20  ;;  %v981_v23 = vpop.f32.mrf.mxu0  ;;  %v1199_v24 = vpop.f32.mrf.mxu1 }
 0x1a7   : > { %v1246_v30 = vmax.f32 %v981_v23, %v1199_v24 }
 0x1a8   : > { %v1745_v26 = vmax.f32 %v1495_v22, %v1696_v21 }
 0x1aa   : > { %v1781_v27 = vadd.f32 %v2820_v53, %v1745_v26 }
 0x1ac   : > { %v1813_v29 = vmax.f32 %v1781_v27, 0.0 }
 0x1ad   : > { %v1449_v31 = vpop.f32.mrf.mxu2  ;;  %v1699_v32 = vpop.f32.mrf.mxu3 }
 0x1ae   : > { %v2473_v33 = vpack.c.bf16 %v1813_v29, %v1812_v28  ;;  %v983_v34 = vpop.f32.mrf.mxu0  ;;  %v1201_v35 = vpop.f32.mrf.mxu1  ;;  %v1496_v36 = vmax.f32 %v1246_v30, %v1449_v31 }
 0x1af   : > { %v1247_v38 = vmax.f32 %v983_v34, %v1201_v35 }
 0x1b0   : > { %2509 = vst [vmem:[%s2831_s28 + $0x50] sm:$0xff] %v2473_v33   ;;  %v1746_v37 = vmax.f32 %v1496_v36, %v1699_v32 }
 0x1b2   : > { %v1782_v44 = vadd.f32 %v2820_v53, %v1746_v37 }
 0x1b4   : > { %v1814_v47 = vmax.f32 %v1782_v44, 0.0 }
 0x1b5   : > { %v1451_v39 = vpop.f32.mrf.mxu2  ;;  %v1701_v40 = vpop.f32.mrf.mxu3 }
 0x1b6   : > { %v1497_v41 = vmax.f32 %v1247_v38, %v1451_v39  ;;  %v986_v42 = vpop.f32.mrf.mxu0  ;;  %v1204_v43 = vpop.f32.mrf.mxu1 }
 0x1b7   : > { %v1248_v49 = vmax.f32 %v986_v42, %v1204_v43 }
 0x1b8   : > { %v1747_v45 = vmax.f32 %v1497_v41, %v1701_v40 }
 0x1ba   : > { %v1783_v46 = vadd.f32 %v2820_v53, %v1747_v45 }
 0x1bc   : > { %v1815_v48 = vmax.f32 %v1783_v46, 0.0 }
 0x1bd   : > { %v1454_v50 = vpop.f32.mrf.mxu2  ;;  %v1704_v51 = vpop.f32.mrf.mxu3 }
 0x1be   : > { %v2478_v52 = vpack.c.bf16 %v1815_v48, %v1814_v47  ;;  %v988_v54 = vpop.f32.mrf.mxu0  ;;  %v1206_v55 = vpop.f32.mrf.mxu1  ;;  %v1498_v56 = vmax.f32 %v1248_v49, %v1454_v50 }
 0x1bf   : > { %v1249_v58 = vmax.f32 %v988_v54, %v1206_v55 }
 0x1c0   : > { %2510 = vst [vmem:[%s2831_s28 + $0x58] sm:$0xff] %v2478_v52   ;;  %v1748_v57 = vmax.f32 %v1498_v56, %v1704_v51 }
 0x1c2   : > { %v1784_v0 = vadd.f32 %v2820_v53, %v1748_v57 }
 0x1c4   : > { %v1816_v3 = vmax.f32 %v1784_v0, 0.0 }
 0x1c5   : > { %v1456_v59 = vpop.f32.mrf.mxu2  ;;  %v1706_v60 = vpop.f32.mrf.mxu3 }
 0x1c6   : > { %v1499_v61 = vmax.f32 %v1249_v58, %v1456_v59  ;;  %v991_v62 = vpop.f32.mrf.mxu0  ;;  %v1209_v63 = vpop.f32.mrf.mxu1 }
 0x1c7   : > { %v1250_v5 = vmax.f32 %v991_v62, %v1209_v63 }
 0x1c8   : > { %v1749_v1 = vmax.f32 %v1499_v61, %v1706_v60 }
 0x1ca   : > { %v1785_v2 = vadd.f32 %v2820_v53, %v1749_v1 }
 0x1cc   : > { %v1817_v4 = vmax.f32 %v1785_v2, 0.0 }
 0x1cd   : > { %v1459_v6 = vpop.f32.mrf.mxu2  ;;  %v1709_v7 = vpop.f32.mrf.mxu3 }
 0x1ce   : > { %v2483_v8 = vpack.c.bf16 %v1817_v4, %v1816_v3  ;;  %v993_v9 = vpop.f32.mrf.mxu0  ;;  %v1211_v10 = vpop.f32.mrf.mxu1  ;;  %v1500_v11 = vmax.f32 %v1250_v5, %v1459_v6 }
 0x1cf   : > { %v1251_v13 = vmax.f32 %v993_v9, %v1211_v10 }
 0x1d0   : > { %2511 = vst [vmem:[%s2831_s28 + $0x60] sm:$0xff] %v2483_v8   ;;  %v1750_v12 = vmax.f32 %v1500_v11, %v1709_v7 }
 0x1d2   : > { %v1786_v19 = vadd.f32 %v2820_v53, %v1750_v12 }
 0x1d4   : > { %v1818_v22 = vmax.f32 %v1786_v19, 0.0 }
 0x1d5   : > { %v1461_v14 = vpop.f32.mrf.mxu2  ;;  %v1711_v15 = vpop.f32.mrf.mxu3 }
 0x1d6   : > { %v1501_v16 = vmax.f32 %v1251_v13, %v1461_v14  ;;  %v996_v17 = vpop.f32.mrf.mxu0  ;;  %v1214_v18 = vpop.f32.mrf.mxu1 }
 0x1d7   : > { %v1252_v24 = vmax.f32 %v996_v17, %v1214_v18 }
 0x1d8   : > { %v1751_v20 = vmax.f32 %v1501_v16, %v1711_v15 }
 0x1da   : > { %v1787_v21 = vadd.f32 %v2820_v53, %v1751_v20 }
 0x1dc   : > { %v1819_v23 = vmax.f32 %v1787_v21, 0.0 }
 0x1dd   : > { %v1464_v25 = vpop.f32.mrf.mxu2  ;;  %v1714_v26 = vpop.f32.mrf.mxu3 }
 0x1de   : > { %v2488_v27 = vpack.c.bf16 %v1819_v23, %v1818_v22  ;;  %v998_v28 = vpop.f32.mrf.mxu0  ;;  %v1216_v29 = vpop.f32.mrf.mxu1  ;;  %v1502_v30 = vmax.f32 %v1252_v24, %v1464_v25 }
 0x1df   : > { %v1253_v32 = vmax.f32 %v998_v28, %v1216_v29 }
 0x1e0   : > { %2512 = vst [vmem:[%s2831_s28 + $0x68] sm:$0xff] %v2488_v27   ;;  %v1752_v31 = vmax.f32 %v1502_v30, %v1714_v26 }
 0x1e2   : > { %v1788_v38 = vadd.f32 %v2820_v53, %v1752_v31 }
 0x1e4   : > { %v1820_v41 = vmax.f32 %v1788_v38, 0.0 }
 0x1e5   : > { %v1466_v33 = vpop.f32.mrf.mxu2  ;;  %v1716_v34 = vpop.f32.mrf.mxu3 }
 0x1e6   : > { %v1503_v35 = vmax.f32 %v1253_v32, %v1466_v33  ;;  %v1001_v36 = vpop.f32.mrf.mxu0  ;;  %v1219_v37 = vpop.f32.mrf.mxu1 }
 0x1e7   : > { %v1254_v43 = vmax.f32 %v1001_v36, %v1219_v37 }
 0x1e8   : > { %v1753_v39 = vmax.f32 %v1503_v35, %v1716_v34 }
 0x1ea   : > { %v1789_v40 = vadd.f32 %v2820_v53, %v1753_v39 }
 0x1ec   : > { %v1821_v42 = vmax.f32 %v1789_v40, 0.0 }
 0x1ed   : > { %v1469_v44 = vpop.f32.mrf.mxu2  ;;  %v1719_v45 = vpop.f32.mrf.mxu3 }
 0x1ee   : > { %v2493_v46 = vpack.c.bf16 %v1821_v42, %v1820_v41  ;;  %v1504_v47 = vmax.f32 %v1254_v43, %v1469_v44  ;;  %v1003_v48 = vpop.f32.mrf.mxu0  ;;  %v1221_v49 = vpop.f32.mrf.mxu1 }
 0x1ef   : > { %v1255_v51 = vmax.f32 %v1003_v48, %v1221_v49 }
 0x1f0   : > { %2513 = vst [vmem:[%s2831_s28 + $0x70] sm:$0xff] %v2493_v46   ;;  %v1754_v50 = vmax.f32 %v1504_v47, %v1719_v45 }
 0x1f2   : > { %v1790_v56 = vadd.f32 %v2820_v53, %v1754_v50 }
 0x1f4   : > { %v1822_v59 = vmax.f32 %v1790_v56, 0.0 }
 0x1f5   : > { %v1471_v52 = vpop.f32.mrf.mxu2  ;;  %v1721_v55 = vpop.f32.mrf.mxu3 }
 0x1f6   : > { %v1505_v54 = vmax.f32 %v1255_v51, %v1471_v52 }
 0x1f8   : > { %v1755_v57 = vmax.f32 %v1505_v54, %v1721_v55 }
 0x1fa   : > { %v1791_v58 = vadd.f32 %v2820_v53, %v1755_v57 }
 0x1fc   : > { %v1823_v60 = vmax.f32 %v1791_v58, 0.0 }
 0x1fe   : > { %v2498_v61 = vpack.c.bf16 %v1823_v60, %v1822_v59 }
 0x200   : > { %2514 = vst [vmem:[%s2831_s28 + $0x78] sm:$0xff] %v2498_v61  }
 0x201 PF: > { %p10_p9 = scmp.ge.s32.totalorder %s2601_s16, 4   ;;  %s2917_s12 = smov %s2558_s13 }
 0x202   : > { %s2918_s13 = smov %s2610_s19  ;;  %s2919_s14 = smov %s2601_s16 }
 0x203   :  { %12 = sbr.rel (!%p10_p9) target bundleno = 2 (0x2), region = 111 }

// kernel: net_forward.4
= control target key start
LH: loop header
LB: loop body
LE: loop exit
PB: predicated region body
PF: predicated region fallthrough
CT: control target
= control target key end

     0   :  { %s1221_s1 = inlined_call_operand.vmem [shape: bf16[256,128], index: 1, kind: input, shape index: {}]   ;;  %s1222_s0 = inlined_call_operand.vmem [shape: bf16[4,56,256], index: 0, kind: input, shape index: {}]   ;;  %s1223_s2 = inlined_call_operand.vmem [shape: f32[1,128], index: 2, kind: input, shape index: {}]   ;;  %s1224_s3 = inlined_call_operand.vmem [shape: bf16[56,128], index: 3, kind: output, shape index: {}]  }
   0x1   :  { %v864_v0 = vld [vmem:[%s1221_s1 + $0x38] sm:$0xff]  ;;  %v876_v2 = vld [vmem:[%s1221_s1 + $0x30] sm:$0xff]  ;;  %v890_v4 = vld [vmem:[%s1221_s1 + $0x28] sm:$0xff] }
   0x2   :  { %v869_v1 = vld [vmem:[%s1221_s1 + $0x78] sm:$0xff]  ;;  %186 = vmatpush.bf16.msra.mxu0 %v864_v0  ;;  %v881_v3 = vld [vmem:[%s1221_s1 + $0x70] sm:$0xff]  ;;  %287 = vmatpush.bf16.msra.mxu2 %v864_v0  ;;  %v895_v5 = vld [vmem:[%s1221_s1 + $0x68] sm:$0xff] }
   0x3   :  { %214 = vmatpush.bf16.msra.mxu1 %v869_v1  ;;  %315 = vmatpush.bf16.msra.mxu3 %v869_v1  ;;  %v904_v6 = vld [vmem:[%s1221_s1 + $0x20] sm:$0xff]  ;;  %v918_v8 = vld [vmem:[%s1221_s1 + $0x18] sm:$0xff]  ;;  %v932_v10 = vld [vmem:[%s1221_s1 + $0x10] sm:$0xff] }
   0x4   :  { %v909_v7 = vld [vmem:[%s1221_s1 + $0x60] sm:$0xff]  ;;  %v923_v9 = vld [vmem:[%s1221_s1 + $0x58] sm:$0xff]  ;;  %v937_v11 = vld [vmem:[%s1221_s1 + $0x50] sm:$0xff] }
   0x5   :  { %v946_v12 = vld [vmem:[%s1221_s1 + $0x8] sm:$0xff]  ;;  %v958_v14 = vld [vmem:[%s1221_s1] sm:$0xff]  ;;  %v699_v20 = vld [vmem:[%s1222_s0 + $0x38] sm:$0xf] }
   0x6   :  { %187 = vmatpush.bf16.msra.mxu0 %v876_v2  ;;  %288 = vmatpush.bf16.msra.mxu2 %v876_v2  ;;  %v951_v13 = vld [vmem:[%s1221_s1 + $0x48] sm:$0xff]  ;;  %v963_v15 = vld [vmem:[%s1221_s1 + $0x40] sm:$0xff]  ;;  %v805_v22 = vld [vmem:[%s1222_s0 + $0x3c] sm:$0xf] }
   0x7   :  { %215 = vmatpush.bf16.msra.mxu1 %v881_v3  ;;  %316 = vmatpush.bf16.msra.mxu3 %v881_v3  ;;  %v604_v16 = vld [vmem:[%s1222_s0] sm:$0xf]  ;;  %v784_v17 = vld [vmem:[%s1222_s0 + $0x4] sm:$0xf0]  ;;  %v783_v18 = vld [vmem:[%s1222_s0 + $0x4] sm:$0xf] }
   0x8   :  { %v606_v19 = vld [vmem:[%s1222_s0 + $0x8] sm:$0xf0]  ;;  %v806_v21 = vld [vmem:[%s1222_s0 + $0x3c] sm:$0xf0]  ;;  %v701_v23 = vld [vmem:[%s1222_s0 + $0x40] sm:$0xf0]  ;;  %v605_v24 = vor.u32 %v784_v17, %v604_v16 }
   0x9   :  { %v609_v25 = vor.u32 %v783_v18, %v606_v19  ;;  %v700_v26 = vor.u32 %v806_v21, %v699_v20  ;;  %v704_v27 = vor.u32 %v805_v22, %v701_v23  ;;  %v612_v28 = vld [vmem:[%s1222_s0 + $0x10] sm:$0xf]  ;;  %v786_v29 = vld [vmem:[%s1222_s0 + $0x14] sm:$0xf0]  ;;  %v785_v30 = vld [vmem:[%s1222_s0 + $0x14] sm:$0xf] }
   0xa   :  { %188 = vmatpush.bf16.msra.mxu0 %v890_v4  ;;  %289 = vmatpush.bf16.msra.mxu2 %v890_v4  ;;  %v614_v31 = vld [vmem:[%s1222_s0 + $0x18] sm:$0xf0]  ;;  %v707_v32 = vld [vmem:[%s1222_s0 + $0x48] sm:$0xf]  ;;  %v808_v33 = vld [vmem:[%s1222_s0 + $0x4c] sm:$0xf0]  ;;  %v613_v36 = vor.u32 %v786_v29, %v612_v28 }
   0xb   :  { %216 = vmatpush.bf16.msra.mxu1 %v895_v5  ;;  %317 = vmatpush.bf16.msra.mxu3 %v895_v5  ;;  %v807_v34 = vld [vmem:[%s1222_s0 + $0x4c] sm:$0xf]  ;;  %v709_v35 = vld [vmem:[%s1222_s0 + $0x50] sm:$0xf0]  ;;  %v617_v37 = vor.u32 %v785_v30, %v614_v31  ;;  %v708_v38 = vor.u32 %v808_v33, %v707_v32  ;;  %v620_v40 = vld [vmem:[%s1222_s0 + $0x20] sm:$0xf] }
   0xc   :  { %v712_v39 = vor.u32 %v807_v34, %v709_v35  ;;  %v788_v41 = vld [vmem:[%s1222_s0 + $0x24] sm:$0xf0]  ;;  %v787_v42 = vld [vmem:[%s1222_s0 + $0x24] sm:$0xf]  ;;  %v622_v43 = vld [vmem:[%s1222_s0 + $0x28] sm:$0xf0] }
   0xd   :  { %v715_v44 = vld [vmem:[%s1222_s0 + $0x58] sm:$0xf]  ;;  %v810_v45 = vld [vmem:[%s1222_s0 + $0x5c] sm:$0xf0]  ;;  %v809_v46 = vld [vmem:[%s1222_s0 + $0x5c] sm:$0xf]  ;;  %v621_v48 = vor.u32 %v788_v41, %v620_v40  ;;  %v625_v49 = vor.u32 %v787_v42, %v622_v43 }
   0xe   :  { %189 = vmatpush.bf16.msra.mxu0 %v904_v6  ;;  %290 = vmatpush.bf16.msra.mxu2 %v904_v6  ;;  %v717_v47 = vld [vmem:[%s1222_s0 + $0x60] sm:$0xf0]  ;;  %v716_v50 = vor.u32 %v810_v45, %v715_v44  ;;  %v20_v52 = vld [vmem:[%s1222_s0 + $0x30] sm:$0xff]  ;;  %v696_v53 = vld [vmem:[%s1222_s0 + $0x68] sm:$0xff] }
   0xf   :  { %217 = vmatpush.bf16.msra.mxu1 %v909_v7  ;;  %318 = vmatpush.bf16.msra.mxu3 %v909_v7  ;;  %v720_v51 = vor.u32 %v809_v46, %v717_v47  ;;  %v72_v54 = vunpack.c.l.b16 %v20_v52  ;;  %v73_v55 = vunpack.c.h.b16 %v20_v52  ;;  %v269_v56 = vunpack.c.l.b16 %v696_v53  ;;  %v730_v62 = vld [vmem:[%s1222_s0 + $0x70] sm:$0xf]  ;;  %v812_v63 = vld [vmem:[%s1222_s0 + $0x74] sm:$0xf0]  ;;  %v819_v16 = vld [vmem:[%s1222_s0 + $0xbc] sm:$0xf] }
  0x10   :  { %v270_v57 = vunpack.c.h.b16 %v696_v53  ;;  %v771_v17 = vld [vmem:[%s1222_s0 + $0xc0] sm:$0xf0]  ;;  %v746_v22 = vld [vmem:[%s1222_s0 + $0x90] sm:$0xf]  ;;  %v816_v23 = vld [vmem:[%s1222_s0 + $0x94] sm:$0xf0] }
  0x11   :  { %v80_v58 = vpack.c.b16 %v72_v54, %v72_v54  ;;  %v81_v59 = vpack.c.b16 %v73_v55, %v73_v55  ;;  %v277_v60 = vpack.c.b16 %v269_v56, %v269_v56  ;;  %v774_v21 = vor.u32 %v819_v16, %v771_v17  ;;  %v821_v28 = vld [vmem:[%s1222_s0 + $0xcc] sm:$0xf]  ;;  %v779_v29 = vld [vmem:[%s1222_s0 + $0xd0] sm:$0xf0]  ;;  %v727_v34 = vld [vmem:[%s1222_s0 + $0xa0] sm:$0xff] }
  0x12   :  { %190 = vmatpush.bf16.msra.mxu0 %v918_v8  ;;  %291 = vmatpush.bf16.msra.mxu2 %v918_v8  ;;  %v278_v61 = vpack.c.b16 %v270_v57, %v270_v57  ;;  %v747_v30 = vor.u32 %v816_v23, %v746_v22  ;;  %v782_v33 = vor.u32 %v821_v28, %v779_v29  ;;  %v758_v35 = vld [vmem:[%s1222_s0 + $0xd8] sm:$0xff] }
  0x13   :  { %218 = vmatpush.bf16.msra.mxu1 %v923_v9  ;;  %319 = vmatpush.bf16.msra.mxu3 %v923_v9 }
  0x16   :  { %191 = vmatpush.bf16.msra.mxu0 %v932_v10  ;;  %292 = vmatpush.bf16.msra.mxu2 %v932_v10 }
  0x17   :  { %219 = vmatpush.bf16.msra.mxu1 %v937_v11  ;;  %320 = vmatpush.bf16.msra.mxu3 %v937_v11 }
  0x1a   :  { %192 = vmatpush.bf16.msra.mxu0 %v946_v12  ;;  %293 = vmatpush.bf16.msra.mxu2 %v946_v12 }
  0x1b   :  { %220 = vmatpush.bf16.msra.mxu1 %v951_v13  ;;  %321 = vmatpush.bf16.msra.mxu3 %v951_v13 }
  0x1e   :  { %193 = vmatpush.bf16.msra.mxu0 %v958_v14  ;;  %294 = vmatpush.bf16.msra.mxu2 %v958_v14 }
  0x1f   :  { %221 = vmatpush.bf16.msra.mxu1 %v963_v15  ;;  %322 = vmatpush.bf16.msra.mxu3 %v963_v15 }
  0x21   :  { %194 = vmatmul.bf16.vlgmr.msra.gmra.mxu0 %v605_v24  ;;  %295 = vmatmul.bf16.vlgmr.msra.gmra.mxu2 %v700_v26  ;;  %v815_v24 = vld [vmem:[%s1222_s0 + $0x94] sm:$0xf]  ;;  %v777_v26 = vld [vmem:[%s1222_s0 + $0xc8] sm:$0xf] }
  0x22   :  { %503 = vmatpush.bf16.msrb.mxu2 %v864_v0  ;;  %222 = vmatmul.bf16.vlgmr.msra.gmra.mxu1 %v609_v25  ;;  %v748_v25 = vld [vmem:[%s1222_s0 + $0x98] sm:$0xf0] }
  0x23   :  { %531 = vmatpush.bf16.msrb.mxu3 %v869_v1  ;;  %395 = vmatpush.bf16.msrb.mxu0 %v864_v0  ;;  %v811_v0 = vld [vmem:[%s1222_s0 + $0x74] sm:$0xf]  ;;  %v751_v31 = vor.u32 %v815_v24, %v748_v25 }
  0x24   :  { %323 = vmatmul.bf16.vlgmr.msra.gmra.mxu3 %v704_v27  ;;  %423 = vmatpush.bf16.msrb.mxu1 %v869_v1  ;;  %v732_v1 = vld [vmem:[%s1222_s0 + $0x78] sm:$0xf0]  ;;  %v822_v27 = vld [vmem:[%s1222_s0 + $0xcc] sm:$0xf0] }
  0x25   :  { %v778_v32 = vor.u32 %v822_v27, %v777_v26 }
  0x26   :  { %504 = vmatpush.bf16.msrb.mxu2 %v876_v2 }
  0x27   :  { %532 = vmatpush.bf16.msrb.mxu3 %v881_v3  ;;  %396 = vmatpush.bf16.msrb.mxu0 %v876_v2  ;;  %v761_v2 = vld [vmem:[%s1222_s0 + $0xa8] sm:$0xf] }
  0x28   :  { %424 = vmatpush.bf16.msrb.mxu1 %v881_v3  ;;  %v818_v3 = vld [vmem:[%s1222_s0 + $0xac] sm:$0xf0] }
  0x2a   :  { %505 = vmatpush.bf16.msrb.mxu2 %v890_v4 }
  0x2b   :  { %533 = vmatpush.bf16.msrb.mxu3 %v895_v5  ;;  %397 = vmatpush.bf16.msrb.mxu0 %v890_v4  ;;  %v817_v4 = vld [vmem:[%s1222_s0 + $0xac] sm:$0xf] }
  0x2c   :  { %425 = vmatpush.bf16.msrb.mxu1 %v895_v5  ;;  %v763_v5 = vld [vmem:[%s1222_s0 + $0xb0] sm:$0xf0] }
  0x2e   :  { %506 = vmatpush.bf16.msrb.mxu2 %v904_v6 }
  0x2f   :  { %534 = vmatpush.bf16.msrb.mxu3 %v909_v7  ;;  %398 = vmatpush.bf16.msrb.mxu0 %v904_v6  ;;  %v731_v6 = vor.u32 %v812_v63, %v730_v62 }
  0x30   :  { %426 = vmatpush.bf16.msrb.mxu1 %v909_v7  ;;  %v735_v7 = vor.u32 %v811_v0, %v732_v1 }
  0x31   :  { %199 = vmatmul.bf16.gmra.mxu0 %v613_v36  ;;  %300 = vmatmul.bf16.gmra.mxu2 %v708_v38  ;;  %v377_v36 = vunpack.c.l.b16 %v727_v34  ;;  %v485_v38 = vunpack.c.l.b16 %v758_v35 }
  0x32   :  { %507 = vmatpush.bf16.msrb.mxu2 %v918_v8  ;;  %227 = vmatmul.bf16.gmra.mxu1 %v617_v37  ;;  %v378_v37 = vunpack.c.h.b16 %v727_v34 }
  0x33   :  { %535 = vmatpush.bf16.msrb.mxu3 %v923_v9  ;;  %399 = vmatpush.bf16.msrb.mxu0 %v918_v8  ;;  %v762_v8 = vor.u32 %v818_v3, %v761_v2  ;;  %v385_v40 = vpack.c.b16 %v377_v36, %v377_v36  ;;  %v493_v42 = vpack.c.b16 %v485_v38, %v485_v38  ;;  %v1190_v38 = vld [vmem:[%s1223_s2] ss:$0 sm:$0xff] }
  0x34   :  { %328 = vmatmul.bf16.gmra.mxu3 %v712_v39  ;;  %427 = vmatpush.bf16.msrb.mxu1 %v923_v9  ;;  %v766_v9 = vor.u32 %v817_v4, %v763_v5  ;;  %v486_v39 = vunpack.c.h.b16 %v758_v35  ;;  %v386_v41 = vpack.c.b16 %v378_v37, %v378_v37 }
  0x36   :  { %508 = vmatpush.bf16.msrb.mxu2 %v932_v10  ;;  %v494_v43 = vpack.c.b16 %v486_v39, %v486_v39 }
  0x37   :  { %536 = vmatpush.bf16.msrb.mxu3 %v937_v11  ;;  %400 = vmatpush.bf16.msrb.mxu0 %v932_v10  ;;  %v738_v10 = vld [vmem:[%s1222_s0 + $0x80] sm:$0xf] }
  0x38   :  { %428 = vmatpush.bf16.msrb.mxu1 %v937_v11  ;;  %v814_v11 = vld [vmem:[%s1222_s0 + $0x84] sm:$0xf0] }
  0x39   :  { %v739_v18 = vor.u32 %v814_v11, %v738_v10 }
  0x3a   :  { %509 = vmatpush.bf16.msrb.mxu2 %v946_v12 }
  0x3b   :  { %537 = vmatpush.bf16.msrb.mxu3 %v951_v13  ;;  %401 = vmatpush.bf16.msrb.mxu0 %v946_v12  ;;  %v813_v12 = vld [vmem:[%s1222_s0 + $0x84] sm:$0xf] }
  0x3c   :  { %429 = vmatpush.bf16.msrb.mxu1 %v951_v13  ;;  %v740_v13 = vld [vmem:[%s1222_s0 + $0x88] sm:$0xf0] }
  0x3d   :  { %v743_v19 = vor.u32 %v813_v12, %v740_v13 }
  0x3e   :  { %510 = vmatpush.bf16.msrb.mxu2 %v958_v14 }
  0x3f   :  { %538 = vmatpush.bf16.msrb.mxu3 %v963_v15  ;;  %402 = vmatpush.bf16.msrb.mxu0 %v958_v14  ;;  %v769_v14 = vld [vmem:[%s1222_s0 + $0xb8] sm:$0xf] }
  0x40   :  { %430 = vmatpush.bf16.msrb.mxu1 %v963_v15  ;;  %v820_v15 = vld [vmem:[%s1222_s0 + $0xbc] sm:$0xf0] }
  0x41   :  { %204 = vmatmul.bf16.gmra.mxu0 %v621_v48  ;;  %305 = vmatmul.bf16.gmra.mxu2 %v716_v50  ;;  %v770_v20 = vor.u32 %v820_v15, %v769_v14 }
  0x42   :  { %232 = vmatmul.bf16.gmra.mxu1 %v625_v49 }
  0x44   :  { %333 = vmatmul.bf16.gmra.mxu3 %v720_v51 }
  0x51   :  { %209 = vmatmul.bf16.gmra.mxu0 %v80_v58  ;;  %310 = vmatmul.bf16.gmra.mxu2 %v277_v60 }
  0x52   :  { %237 = vmatmul.bf16.gmra.mxu1 %v81_v59 }
  0x54   :  { %338 = vmatmul.bf16.gmra.mxu3 %v278_v61 }
  0x61   :  { %403 = vmatmul.bf16.vlgmr.msrb.gmra.mxu0 %v731_v6  ;;  %511 = vmatmul.bf16.vlgmr.msrb.gmra.mxu2 %v762_v8 }
  0x62   :  { %431 = vmatmul.bf16.vlgmr.msrb.gmra.mxu1 %v735_v7 }
  0x64   :  { %539 = vmatmul.bf16.vlgmr.msrb.gmra.mxu3 %v766_v9 }
  0x71   :  { %408 = vmatmul.bf16.gmra.mxu0 %v739_v18  ;;  %516 = vmatmul.bf16.gmra.mxu2 %v770_v20 }
  0x72   :  { %436 = vmatmul.bf16.gmra.mxu1 %v743_v19 }
  0x74   :  { %544 = vmatmul.bf16.gmra.mxu3 %v774_v21 }
  0x81   :  { %413 = vmatmul.bf16.gmra.mxu0 %v747_v30  ;;  %521 = vmatmul.bf16.gmra.mxu2 %v778_v32 }
  0x82   :  { %441 = vmatmul.bf16.gmra.mxu1 %v751_v31 }
  0x84   :  { %549 = vmatmul.bf16.gmra.mxu3 %v782_v33 }
  0x91   :  { %418 = vmatmul.bf16.gmra.mxu0 %v385_v40  ;;  %526 = vmatmul.bf16.gmra.mxu2 %v493_v42 }
  0x92   :  { %446 = vmatmul.bf16.gmra.mxu1 %v386_v41 }
  0x94   :  { %554 = vmatmul.bf16.gmra.mxu3 %v494_v43 }
  0x9e   :  { %v195_v44 = vpop.f32.mrf.mxu0 }
  0x9f   :  { %v223_v45 = vpop.f32.mrf.mxu1 }
  0xa0   :  { %v224_v46 = vadd.f32 %v223_v45, %v195_v44 }
  0xa4   :  { %v296_v47 = vpop.f32.mrf.mxu2 }
  0xa6   :  { %v197_v50 = vpop.f32.mrf.mxu0 }
  0xa7   :  { %v324_v48 = vpop.f32.mrf.mxu3  ;;  %v225_v51 = vpop.f32.mrf.mxu1 }
  0xa8   :  { %v325_v49 = vadd.f32 %v324_v48, %v296_v47  ;;  %v226_v52 = vadd.f32 %v225_v51, %v197_v50 }
  0xaa   :  { %v343_v53 = vmax.f32 %v224_v46, %v325_v49 }
  0xac   :  { %v298_v54 = vpop.f32.mrf.mxu2 }
  0xae   :  { %v200_v56 = vpop.f32.mrf.mxu0 }
  0xaf   :  { %v326_v55 = vpop.f32.mrf.mxu3  ;;  %v228_v57 = vpop.f32.mrf.mxu1 }
  0xb0   :  { %v1161_v58 = vadd.f32 %v228_v57, %v200_v56  ;;  %v327_v32 = vadd.f32 %v326_v55, %v298_v54 }
  0xb2   :  { %v344_v36 = vmax.f32 %v226_v52, %v327_v32 }
  0xb4   :  { %v301_v59 = vpop.f32.mrf.mxu2 }
  0xb6   :  { %v202_v62 = vpop.f32.mrf.mxu0 }
  0xb7   :  { %v329_v60 = vpop.f32.mrf.mxu3  ;;  %v230_v63 = vpop.f32.mrf.mxu1 }
  0xb8   :  { %v1163_v61 = vadd.f32 %v329_v60, %v301_v59  ;;  %v1165_v0 = vadd.f32 %v230_v63, %v202_v62 }
  0xba   :  { %v345_v1 = vmax.f32 %v1161_v58, %v1163_v61 }
  0xbc   :  { %v303_v2 = vpop.f32.mrf.mxu2 }
  0xbe   :  { %v205_v4 = vpop.f32.mrf.mxu0 }
  0xbf   :  { %v331_v3 = vpop.f32.mrf.mxu3  ;;  %v233_v5 = vpop.f32.mrf.mxu1 }
  0xc0   :  { %v1169_v6 = vadd.f32 %v233_v5, %v205_v4  ;;  %v332_v56 = vadd.f32 %v331_v3, %v303_v2 }
  0xc2   :  { %v346_v60 = vmax.f32 %v1165_v0, %v332_v56 }
  0xc4   :  { %v306_v7 = vpop.f32.mrf.mxu2 }
  0xc6   :  { %v207_v10 = vpop.f32.mrf.mxu0 }
  0xc7   :  { %v334_v8 = vpop.f32.mrf.mxu3  ;;  %v235_v11 = vpop.f32.mrf.mxu1 }
  0xc8   :  { %v1171_v9 = vadd.f32 %v334_v8, %v306_v7  ;;  %v1173_v12 = vadd.f32 %v235_v11, %v207_v10 }
  0xca   :  { %v347_v13 = vmax.f32 %v1169_v6, %v1171_v9 }
  0xcc   :  { %v1177_v14 = vpop.f32.mrf.mxu2 }
  0xce   :  { %v210_v16 = vpop.f32.mrf.mxu0 }
  0xcf   :  { %v1179_v15 = vpop.f32.mrf.mxu3  ;;  %v238_v17 = vpop.f32.mrf.mxu1 }
  0xd0   :  { %v1181_v18 = vadd.f32 %v238_v17, %v210_v16 }
  0xd4   :  { %v1183_v19 = vpop.f32.mrf.mxu2 }
  0xd6   :  { %v212_v21 = vpop.f32.mrf.mxu0 }
  0xd7   :  { %v1185_v20 = vpop.f32.mrf.mxu3  ;;  %v240_v22 = vpop.f32.mrf.mxu1 }
  0xdc   :  { %v313_v23 = vpop.f32.mrf.mxu2 }
  0xde   :  { %v404_v25 = vpop.f32.mrf.mxu0 }
  0xdf   :  { %v341_v24 = vpop.f32.mrf.mxu3  ;;  %v432_v26 = vpop.f32.mrf.mxu1 }
  0xe0   :  { %v433_v29 = vadd.f32 %v432_v26, %v404_v25  ;;  %v337_v24 = vadd.f32 %v1179_v15, %v1177_v14  ;;  %v340_v14 = vadd.f32 %v1185_v20, %v1183_v19 }
  0xe2   :  { %v451_v34 = vmax.f32 %v343_v53, %v433_v29  ;;  %v349_v9 = vmax.f32 %v1181_v18, %v340_v14 }
  0xe4   :  { %v512_v27 = vpop.f32.mrf.mxu2 }
  0xe6   :  { %v406_v30 = vpop.f32.mrf.mxu0 }
  0xe7   :  { %v540_v28 = vpop.f32.mrf.mxu3  ;;  %v434_v31 = vpop.f32.mrf.mxu1 }
  0xe8   :  { %v541_v33 = vadd.f32 %v540_v28, %v512_v27  ;;  %v435_v35 = vadd.f32 %v434_v31, %v406_v30  ;;  %v348_v28 = vmax.f32 %v1173_v12, %v337_v24 }
  0xea   :  { %v559_v37 = vmax.f32 %v451_v34, %v541_v33  ;;  %v452_v41 = vmax.f32 %v344_v36, %v435_v35 }
  0xec   :  { %v514_v39 = vpop.f32.mrf.mxu2  ;;  %v570_v45 = vadd.f32 %v1190_v38, %v559_v37 }
  0xee   :  { %v409_v43 = vpop.f32.mrf.mxu0  ;;  %v577_v48 = vmax.f32 %v570_v45, 0.0 }
  0xef   :  { %v542_v40 = vpop.f32.mrf.mxu3  ;;  %v437_v44 = vpop.f32.mrf.mxu1 }
  0xf0   :  { %v543_v42 = vadd.f32 %v542_v40, %v514_v39  ;;  %v438_v53 = vadd.f32 %v437_v44, %v409_v43 }
  0xf2   :  { %v560_v46 = vmax.f32 %v452_v41, %v543_v42  ;;  %v453_v58 = vmax.f32 %v345_v1, %v438_v53 }
  0xf4   :  { %v571_v47 = vadd.f32 %v1190_v38, %v560_v46  ;;  %v517_v50 = vpop.f32.mrf.mxu2 }
  0xf6   :  { %v578_v49 = vmax.f32 %v571_v47, 0.0  ;;  %v411_v54 = vpop.f32.mrf.mxu0 }
  0xf7   :  { %v545_v51 = vpop.f32.mrf.mxu3  ;;  %v439_v55 = vpop.f32.mrf.mxu1 }
  0xf8   :  { %v826_v52 = vpack.c.bf16 %v578_v49, %v577_v48  ;;  %v546_v57 = vadd.f32 %v545_v51, %v517_v50  ;;  %v440_v59 = vadd.f32 %v439_v55, %v411_v54 }
  0xfa   :  { %827 = vst [vmem:[%s1224_s3] sm:$0xff] %v826_v52   ;;  %v561_v61 = vmax.f32 %v453_v58, %v546_v57  ;;  %v454_v4 = vmax.f32 %v346_v60, %v440_v59 }
  0xfc   :  { %v519_v62 = vpop.f32.mrf.mxu2  ;;  %v572_v10 = vadd.f32 %v1190_v38, %v561_v61 }
  0xfe   :  { %v414_v7 = vpop.f32.mrf.mxu0  ;;  %v579_v3 = vmax.f32 %v572_v10, 0.0 }
  0xff   :  { %v547_v63 = vpop.f32.mrf.mxu3  ;;  %v442_v8 = vpop.f32.mrf.mxu1 }
 0x100   :  { %v548_v5 = vadd.f32 %v547_v63, %v519_v62  ;;  %v443_v22 = vadd.f32 %v442_v8, %v414_v7 }
 0x102   :  { %v562_v11 = vmax.f32 %v454_v4, %v548_v5  ;;  %v455_v26 = vmax.f32 %v347_v13, %v443_v22 }
 0x104   :  { %v573_v2 = vadd.f32 %v1190_v38, %v562_v11  ;;  %v522_v17 = vpop.f32.mrf.mxu2 }
 0x106   :  { %v580_v16 = vmax.f32 %v573_v2, 0.0  ;;  %v416_v23 = vpop.f32.mrf.mxu0 }
 0x107   :  { %v550_v21 = vpop.f32.mrf.mxu3  ;;  %v444_v0 = vpop.f32.mrf.mxu1 }
 0x108   :  { %v831_v1 = vpack.c.bf16 %v580_v16, %v579_v3  ;;  %v551_v25 = vadd.f32 %v550_v21, %v522_v17  ;;  %v445_v27 = vadd.f32 %v444_v0, %v416_v23 }
 0x10a   :  { %838 = vst [vmem:[%s1224_s3 + $0x8] sm:$0xff] %v831_v1   ;;  %v563_v29 = vmax.f32 %v455_v26, %v551_v25  ;;  %v456_v32 = vmax.f32 %v348_v28, %v445_v27 }
 0x10c   :  { %v524_v30 = vpop.f32.mrf.mxu2  ;;  %v574_v15 = vadd.f32 %v1190_v38, %v563_v29 }
 0x10e   :  { %v419_v34 = vpop.f32.mrf.mxu0  ;;  %v581_v13 = vmax.f32 %v574_v15, 0.0 }
 0x10f   :  { %v552_v31 = vpop.f32.mrf.mxu3  ;;  %v447_v35 = vpop.f32.mrf.mxu1 }
 0x110   :  { %v553_v33 = vadd.f32 %v552_v31, %v524_v30  ;;  %v448_v6 = vadd.f32 %v447_v35, %v419_v34 }
 0x112   :  { %v564_v36 = vmax.f32 %v456_v32, %v553_v33  ;;  %v457_v42 = vmax.f32 %v349_v9, %v448_v6 }
 0x114   :  { %v575_v37 = vadd.f32 %v1190_v38, %v564_v36  ;;  %v527_v39 = vpop.f32.mrf.mxu2 }
 0x116   :  { %v582_v12 = vmax.f32 %v575_v37, 0.0  ;;  %v421_v44 = vpop.f32.mrf.mxu0 }
 0x117   :  { %v555_v40 = vpop.f32.mrf.mxu3  ;;  %v449_v45 = vpop.f32.mrf.mxu1 }
 0x118   :  { %v836_v41 = vpack.c.bf16 %v582_v12, %v581_v13  ;;  %v556_v43 = vadd.f32 %v555_v40, %v527_v39 }
 0x11a   :  { %839 = vst [vmem:[%s1224_s3 + $0x10] sm:$0xff] %v836_v41   ;;  %v565_v19 = vmax.f32 %v457_v42, %v556_v43 }
 0x11c   :  { %v576_v20 = vadd.f32 %v1190_v38, %v565_v19  ;;  %v529_v47 = vpop.f32.mrf.mxu2 }
 0x11e   :  { %v583_v46 = vmax.f32 %v576_v20, 0.0 }
 0x11f   :  { %v557_v48 = vpop.f32.mrf.mxu3 }
 0x120   :  { %v590_v18 = vpack.c.bf16 %v583_v46, %v583_v46 }
 0x122   :  { %597 = vst [vmem:[%s1224_s3 + $0x18] sm:$0xf] %v590_v18 }

// kernel: net_forward.5
= control target key start
LH: loop header
LB: loop body
LE: loop exit
PB: predicated region body
PF: predicated region fallthrough
CT: control target
= control target key end

     0   :  { %s970_s1 = inlined_call_operand.vmem [shape: bf16[512,128], index: 1, kind: input, shape index: {}]   ;;  %s971_s2 = inlined_call_operand.vmem [shape: f32[1,128], index: 2, kind: input, shape index: {}]   ;;  %s972_s0 = inlined_call_operand.vmem [shape: bf16[8,512], index: 0, kind: input, shape index: {}]   ;;  %s973_s3 = inlined_call_operand.vmem [shape: bf16[128,128], index: 3, kind: input, shape index: {}]   ;;  %s974_s4 = inlined_call_operand.vmem [shape: f32[1,128], index: 4, kind: input, shape index: {}]   ;;  %s975_s5 = inlined_call_operand.vmem [shape: bf16[128,128], index: 5, kind: input, shape index: {}]   ;;  %s976_s6 = inlined_call_operand.vmem [shape: f32[1,128], index: 6, kind: input, shape index: {}]   ;;  %s977_s7 = inlined_call_operand.vmem [shape: f32[8,128], index: 7, kind: output, shape index: {}]  }
   0x1   :  { %v724_v0 = vld [vmem:[%s970_s1 + $0x38] sm:$0xff]  ;;  %v723_v4 = vld [vmem:[%s970_s1 + $0x30] sm:$0xff]  ;;  %v722_v8 = vld [vmem:[%s970_s1 + $0x28] sm:$0xff] }
   0x2   :  { %v732_v1 = vld [vmem:[%s970_s1 + $0x78] sm:$0xff]  ;;  %302 = vmatpush.bf16.msra.mxu0 %v724_v0  ;;  %v731_v5 = vld [vmem:[%s970_s1 + $0x70] sm:$0xff]  ;;  %v730_v9 = vld [vmem:[%s970_s1 + $0x68] sm:$0xff] }
   0x3   :  { %v740_v2 = vld [vmem:[%s970_s1 + $0xb8] sm:$0xff]  ;;  %315 = vmatpush.bf16.msra.mxu1 %v732_v1  ;;  %v739_v6 = vld [vmem:[%s970_s1 + $0xb0] sm:$0xff]  ;;  %v738_v10 = vld [vmem:[%s970_s1 + $0xa8] sm:$0xff] }
   0x4   :  { %v748_v3 = vld [vmem:[%s970_s1 + $0xf8] sm:$0xff]  ;;  %328 = vmatpush.bf16.msra.mxu2 %v740_v2  ;;  %v747_v7 = vld [vmem:[%s970_s1 + $0xf0] sm:$0xff]  ;;  %v746_v11 = vld [vmem:[%s970_s1 + $0xe8] sm:$0xff] }
   0x5   :  { %341 = vmatpush.bf16.msra.mxu3 %v748_v3  ;;  %v721_v12 = vld [vmem:[%s970_s1 + $0x20] sm:$0xff]  ;;  %v720_v16 = vld [vmem:[%s970_s1 + $0x18] sm:$0xff]  ;;  %v719_v20 = vld [vmem:[%s970_s1 + $0x10] sm:$0xff] }
   0x6   :  { %303 = vmatpush.bf16.msra.mxu0 %v723_v4  ;;  %v729_v13 = vld [vmem:[%s970_s1 + $0x60] sm:$0xff]  ;;  %v728_v17 = vld [vmem:[%s970_s1 + $0x58] sm:$0xff]  ;;  %v727_v21 = vld [vmem:[%s970_s1 + $0x50] sm:$0xff] }
   0x7   :  { %316 = vmatpush.bf16.msra.mxu1 %v731_v5  ;;  %v737_v14 = vld [vmem:[%s970_s1 + $0xa0] sm:$0xff]  ;;  %v736_v18 = vld [vmem:[%s970_s1 + $0x98] sm:$0xff]  ;;  %v735_v22 = vld [vmem:[%s970_s1 + $0x90] sm:$0xff] }
   0x8   :  { %329 = vmatpush.bf16.msra.mxu2 %v739_v6  ;;  %v745_v15 = vld [vmem:[%s970_s1 + $0xe0] sm:$0xff]  ;;  %v744_v19 = vld [vmem:[%s970_s1 + $0xd8] sm:$0xff]  ;;  %v743_v23 = vld [vmem:[%s970_s1 + $0xd0] sm:$0xff] }
   0x9   :  { %342 = vmatpush.bf16.msra.mxu3 %v747_v7  ;;  %v718_v24 = vld [vmem:[%s970_s1 + $0x8] sm:$0xff]  ;;  %v26_v26 = vld [vmem:[%s972_s0] sm:$0xff]  ;;  %v756_v38 = vld [vmem:[%s973_s3 + $0x38] sm:$0xff] }
   0xa   :  { %304 = vmatpush.bf16.msra.mxu0 %v722_v8  ;;  %v726_v25 = vld [vmem:[%s970_s1 + $0x48] sm:$0xff]  ;;  %v98_v30 = vunpack.c.l.b16 %v26_v26  ;;  %v99_v31 = vunpack.c.h.b16 %v26_v26  ;;  %v717_v32 = vld [vmem:[%s970_s1] sm:$0xff]  ;;  %v755_v43 = vld [vmem:[%s973_s3 + $0x30] sm:$0xff] }
   0xb   :  { %317 = vmatpush.bf16.msra.mxu1 %v730_v9  ;;  %v734_v27 = vld [vmem:[%s970_s1 + $0x88] sm:$0xff]  ;;  %v725_v33 = vld [vmem:[%s970_s1 + $0x40] sm:$0xff]  ;;  %v752_v46 = vld [vmem:[%s973_s3 + $0x18] sm:$0xff] }
   0xc   :  { %330 = vmatpush.bf16.msra.mxu2 %v738_v10  ;;  %v742_v28 = vld [vmem:[%s970_s1 + $0xc8] sm:$0xff]  ;;  %v733_v36 = vld [vmem:[%s970_s1 + $0x80] sm:$0xff]  ;;  %v102_v39 = vpack.c.b16 %v98_v30, %v98_v30  ;;  %v103_v40 = vpack.c.b16 %v99_v31, %v99_v31  ;;  %v751_v47 = vld [vmem:[%s973_s3 + $0x10] sm:$0xff] }
   0xd   :  { %343 = vmatpush.bf16.msra.mxu3 %v746_v11  ;;  %v27_v29 = vld [vmem:[%s972_s0 + $0x8] sm:$0xff]  ;;  %v741_v37 = vld [vmem:[%s970_s1 + $0xc0] sm:$0xff]  ;;  %v764_v50 = vld [vmem:[%s975_s5 + $0x38] sm:$0xff] }
   0xe   :  { %305 = vmatpush.bf16.msra.mxu0 %v721_v12  ;;  %v100_v34 = vunpack.c.l.b16 %v27_v29  ;;  %v101_v35 = vunpack.c.h.b16 %v27_v29  ;;  %v754_v44 = vld [vmem:[%s973_s3 + $0x28] sm:$0xff]  ;;  %v753_v45 = vld [vmem:[%s973_s3 + $0x20] sm:$0xff]  ;;  %v763_v51 = vld [vmem:[%s975_s5 + $0x30] sm:$0xff] }
   0xf   :  { %318 = vmatpush.bf16.msra.mxu1 %v729_v13  ;;  %v750_v48 = vld [vmem:[%s973_s3 + $0x8] sm:$0xff]  ;;  %v749_v49 = vld [vmem:[%s973_s3] sm:$0xff]  ;;  %v760_v55 = vld [vmem:[%s975_s5 + $0x18] sm:$0xff] }
  0x10   :  { %331 = vmatpush.bf16.msra.mxu2 %v737_v14  ;;  %v104_v41 = vpack.c.b16 %v100_v34, %v100_v34  ;;  %v105_v42 = vpack.c.b16 %v101_v35, %v101_v35  ;;  %v762_v52 = vld [vmem:[%s975_s5 + $0x28] sm:$0xff]  ;;  %v761_v53 = vld [vmem:[%s975_s5 + $0x20] sm:$0xff]  ;;  %v759_v59 = vld [vmem:[%s975_s5 + $0x10] sm:$0xff] }
  0x11   :  { %344 = vmatpush.bf16.msra.mxu3 %v745_v15  ;;  %v765_v54 = vld [vmem:[%s971_s2] ss:$0 sm:$0xff]  ;;  %v758_v7 = vld [vmem:[%s975_s5 + $0x8] sm:$0xff] }
  0x12   :  { %306 = vmatpush.bf16.msra.mxu0 %v720_v16  ;;  %v757_v8 = vld [vmem:[%s975_s5] sm:$0xff] }
  0x13   :  { %319 = vmatpush.bf16.msra.mxu1 %v728_v17  ;;  %v766_v9 = vld [vmem:[%s974_s4] ss:$0 sm:$0xff] }
  0x14   :  { %332 = vmatpush.bf16.msra.mxu2 %v736_v18  ;;  %v767_v15 = vld [vmem:[%s976_s6] ss:$0 sm:$0xff] }
  0x15   :  { %345 = vmatpush.bf16.msra.mxu3 %v744_v19 }
  0x16   :  { %307 = vmatpush.bf16.msra.mxu0 %v719_v20 }
  0x17   :  { %320 = vmatpush.bf16.msra.mxu1 %v727_v21 }
  0x18   :  { %333 = vmatpush.bf16.msra.mxu2 %v735_v22 }
  0x19   :  { %346 = vmatpush.bf16.msra.mxu3 %v743_v23 }
  0x1a   :  { %308 = vmatpush.bf16.msra.mxu0 %v718_v24 }
  0x1b   :  { %321 = vmatpush.bf16.msra.mxu1 %v726_v25 }
  0x1c   :  { %334 = vmatpush.bf16.msra.mxu2 %v734_v27 }
  0x1d   :  { %347 = vmatpush.bf16.msra.mxu3 %v742_v28 }
  0x1e   :  { %309 = vmatpush.bf16.msra.mxu0 %v717_v32 }
  0x1f   :  { %322 = vmatpush.bf16.msra.mxu1 %v725_v33 }
  0x20   :  { %335 = vmatpush.bf16.msra.mxu2 %v733_v36 }
  0x21   :  { %348 = vmatpush.bf16.msra.mxu3 %v741_v37  ;;  %310 = vmatmul.bf16.vlgmr.msra.gmra.mxu0 %v102_v39 }
  0x22   :  { %424 = vmatpush.bf16.msrb.mxu0 %v756_v38  ;;  %323 = vmatmul.bf16.vlgmr.msra.gmra.mxu1 %v103_v40 }
  0x23   :  { %336 = vmatmul.bf16.vlgmr.msra.gmra.mxu2 %v104_v41  ;;  %507 = vmatpush.bf16.msrb.mxu1 %v764_v50 }
  0x24   :  { %349 = vmatmul.bf16.vlgmr.msra.gmra.mxu3 %v105_v42 }
  0x26   :  { %425 = vmatpush.bf16.msrb.mxu0 %v755_v43 }
  0x27   :  { %508 = vmatpush.bf16.msrb.mxu1 %v763_v51 }
  0x2a   :  { %426 = vmatpush.bf16.msrb.mxu0 %v754_v44 }
  0x2b   :  { %509 = vmatpush.bf16.msrb.mxu1 %v762_v52 }
  0x2e   :  { %427 = vmatpush.bf16.msrb.mxu0 %v753_v45 }
  0x2f   :  { %510 = vmatpush.bf16.msrb.mxu1 %v761_v53 }
  0x32   :  { %428 = vmatpush.bf16.msrb.mxu0 %v752_v46 }
  0x33   :  { %511 = vmatpush.bf16.msrb.mxu1 %v760_v55 }
  0x36   :  { %429 = vmatpush.bf16.msrb.mxu0 %v751_v47 }
  0x37   :  { %512 = vmatpush.bf16.msrb.mxu1 %v759_v59 }
  0x3a   :  { %430 = vmatpush.bf16.msrb.mxu0 %v750_v48 }
  0x3b   :  { %513 = vmatpush.bf16.msrb.mxu1 %v758_v7 }
  0x3e   :  { %431 = vmatpush.bf16.msrb.mxu0 %v749_v49 }
  0x3f   :  { %514 = vmatpush.bf16.msrb.mxu1 %v757_v8 }
  0x9e   :  { %v311_v56 = vpop.f32.mrf.mxu0 }
  0x9f   :  { %v324_v57 = vpop.f32.mrf.mxu1  ;;  %v312_v58 = vadd.f32 %v765_v54, %v311_v56 }
  0xa1   :  { %v325_v60 = vadd.f32 %v324_v57, %v312_v58 }
  0xa6   :  { %v337_v61 = vpop.f32.mrf.mxu2  ;;  %v313_v0 = vpop.f32.mrf.mxu0 }
  0xa7   :  { %v350_v62 = vpop.f32.mrf.mxu3  ;;  %v338_v63 = vadd.f32 %v337_v61, %v325_v60  ;;  %v326_v1 = vpop.f32.mrf.mxu1 }
  0xa9   :  { %v351_v2 = vadd.f32 %v350_v62, %v338_v63 }
  0xab   :  { %v354_v3 = vmax.f32 %v351_v2, 0.0 }
  0xad   :  { %v355_v4 = vpack.c.bf16 %v354_v3, %v354_v3 }
  0xae   :  { %v339_v5 = vpop.f32.mrf.mxu2 }
  0xaf   :  { %v352_v6 = vpop.f32.mrf.mxu3  ;;  %432 = vmatmul.bf16.vlgmr.msrb.gmra.mxu0 %v355_v4 }
 0x12c   :  { %v433_v10 = vpop.f32.mrf.mxu0 }
 0x12d   :  { %v434_v11 = vadd.f32 %v766_v9, %v433_v10 }
 0x12f   :  { %v437_v12 = vmax.f32 %v434_v11, 0.0 }
 0x131   :  { %v438_v13 = vpack.c.bf16 %v437_v12, %v437_v12 }
 0x133   :  { %515 = vmatmul.bf16.vlgmr.msrb.gmra.mxu1 %v438_v13 }
 0x134   :  { %v435_v14 = vpop.f32.mrf.mxu0 }
 0x1b0   :  { %v516_v16 = vpop.f32.mrf.mxu1 }
 0x1b1   :  { %v517_v17 = vadd.f32 %v767_v15, %v516_v16 }
 0x1b3   :  { %520 = vst [vmem:[%s977_s7] sm:$0xff] %v517_v17 }
 0x1b8   :  { %v518_v18 = vpop.f32.mrf.mxu1 }

</bundles_post_ra>
